<compile_context>
chip_gen: v7x
topology: tpu7x:2x2x1
jax: 0.10.0
libtpu: 0.0.40
codegen_flags: <defaults>
</compile_context>

<pallas_src>
import functools

import jax
import jax.numpy as jnp
from jax import lax
from jax.experimental import pallas as pl

# ----------------------------- sizes (small) ---------------------------------
B = 2            # batch
LQ = 8           # decoder length L'
LK = 10          # memory length L
EMB = 16         # embedding_dim
HID = 32         # hidden_size (== memory feature dim, num_directions=1)
VOCAB = 24       # num_embeddings
NUM_LAYERS = 2   # LSTM layers
NUM_HEADS = 2    # attention heads
HEAD_DIM = HID // NUM_HEADS

F32 = jnp.float32
BF16 = jnp.bfloat16

# Column offsets inside the packed slabs (each segment padded to 128 lanes).
W_WHH0, W_WIH1, W_WHH1, W_WKV, W_WQ, W_WO, W_WOUT = 0, 128, 256, 384, 512, 640, 768
B_B0, B_B1, B_BKV, B_BQ, B_BO, B_BOUT = 0, 128, 256, 384, 512, 640


def _mm(a, w):
    """MXU matmul: bf16 operands, f32 accumulation."""
    return jnp.dot(a.astype(BF16), w.astype(BF16), preferred_element_type=F32)


def _mm_nt(a, b):
    """a @ b.T (contract last dims of both) without an explicit transpose."""
    return lax.dot_general(a.astype(BF16), b.astype(BF16),
                           (((1,), (1,)), ((), ())),
                           preferred_element_type=F32)


# --------------------------- fused decoder kernel -----------------------------
def _decoder_fused_kernel(x_ref, h0_ref, c0_ref, mem_ref, mask_ref,
                          wih0_ref, wslab_ref, brow_ref,
                          logp_ref, attnw_ref):
    """Whole decoder forward (both batch elements) in one invocation.

    x_ref:    (LQ*B, EMB)        embedded tokens, TIME-MAJOR (row = t*B + b)
    h0/c0:    (NUM_LAYERS, B, HID)
    mem_ref:  (B, LK, HID)
    mask_ref: (B, LK)            1.0 where the key position is padded
    wih0_ref: (EMB, 4*HID)
    wslab_ref:(HID, 896)         packed [whh0|wih1|whh1|wk|wv|wq|wo|w_out]
    brow_ref: (1, 768)           packed [b0|b1|bk|bv|bq|bo|b_out]
    logp_ref: (B, LQ, VOCAB)     output log-probs
    attnw_ref:(B, LQ, LK)        head-averaged attention weights
    Gate order follows PyTorch: i, f, g, o.
    """
    T, H, HD = LQ, HID, HEAD_DIM
    scale = 1.0 / float(HD) ** 0.5

    # Static slices of the packed slabs (aligned lane offsets); cast once.
    whh0_bf = wslab_ref[:, W_WHH0:W_WHH0 + 4 * H].astype(BF16)
    wih1_bf = wslab_ref[:, W_WIH1:W_WIH1 + 4 * H].astype(BF16)
    whh1_bf = wslab_ref[:, W_WHH1:W_WHH1 + 4 * H].astype(BF16)
    wkv_bf = wslab_ref[:, W_WKV:W_WKV + 2 * H].astype(BF16)      # K|V fused
    wq_bf = wslab_ref[:, W_WQ:W_WQ + H].astype(BF16)
    wo_bf = wslab_ref[:, W_WO:W_WO + H].astype(BF16)
    wout_bf = wslab_ref[:, W_WOUT:W_WOUT + VOCAB].astype(BF16)

    b0 = brow_ref[:, B_B0:B_B0 + 4 * H]
    b1 = brow_ref[:, B_B1:B_B1 + 4 * H]
    bkv = brow_ref[:, B_BKV:B_BKV + 2 * H]
    bq = brow_ref[:, B_BQ:B_BQ + H]
    bo = brow_ref[:, B_BO:B_BO + H]
    bout = brow_ref[:, B_BOUT:B_BOUT + VOCAB]

    def lstm_layer(gates_in, whh_bf, h, c):
        """Batched recurrence: h/c are (B, H); gates_in is (T*B, 4H) time-major.
        Returns the list of per-timestep hidden states (kept in registers)."""
        hs = []
        for t in range(T):                               # static unroll (T = 8)
            g = gates_in[t * B:(t + 1) * B, :] + jnp.dot(
                h.astype(BF16), whh_bf, preferred_element_type=F32)  # (B, 4H)
            s = jax.nn.sigmoid(g)                        # one full-width EUP op
            th = jnp.tanh(g)                             # one full-width EUP op
            i, f = s[:, 0:H], s[:, H:2 * H]              # PyTorch order i,f,g,o
            gg, o = th[:, 2 * H:3 * H], s[:, 3 * H:4 * H]
            c = f * c + i * gg
            h = o * jnp.tanh(c)
            hs.append(h)
        return hs

    # ------------------------------ 2-layer LSTM ------------------------------
    # Hoisted input projections: one matmul over all (t, b) rows per layer.
    gates0 = _mm(x_ref[...], wih0_ref[...]) + b0          # (T*B, 4H)
    hs0 = lstm_layer(gates0, whh0_bf, h0_ref[0], c0_ref[0])
    dec0_tm = jnp.concatenate(hs0, axis=0)                # (T*B, H), registers
    gates1 = _mm(dec0_tm, wih1_bf) + b1                   # (T*B, 4H)
    hs1 = lstm_layer(gates1, whh1_bf, h0_ref[1], c0_ref[1])

    # ------------- multi-head attention + output head (unrolled B) -----------
    for b in range(B):                                    # static unroll (B = 2)
        dec_b = jnp.concatenate([h[b:b + 1, :] for h in hs1], axis=0)  # (T, H)
        q_all = _mm(dec_b, wq_bf) + bq                    # (T, H)
        kv = _mm(mem_ref[b], wkv_bf) + bkv                # (LK, 2H): cols K | V
        # key_padding_mask additive bias (-1e9 instead of -inf: diverges from
        # PyTorch only in the degenerate all-keys-padded case, NaN there).
        neg = mask_ref[b:b + 1, :] * (-1e9)               # (1, LK)

        attn_out = jnp.zeros((T, H), F32) + bo            # out-proj bias folded
        w_sum = jnp.zeros((T, LK), F32)
        for hh in range(NUM_HEADS):                       # static unroll (NH=2)
            lo, hi = hh * HD, (hh + 1) * HD
            scores = _mm_nt(q_all[:, lo:hi], kv[:, lo:hi]) * scale + neg
            m = jnp.max(scores, axis=-1, keepdims=True)
            e = jnp.exp(scores - m)
            p = e * pl.reciprocal(jnp.sum(e, axis=-1, keepdims=True), approx=True)
            vo = _mm(kv[:, H + lo:H + hi], wo_bf[lo:hi, :])   # (LK, H)
            attn_out = attn_out + _mm(p, vo)
            w_sum = w_sum + p
        attnw_ref[b] = w_sum * (1.0 / NUM_HEADS)          # head-averaged weights

        # ------------------- output projection + log-softmax ------------------
        z = _mm(attn_out, wout_bf) + bout                 # (T, VOCAB)
        zm = z - jnp.max(z, axis=-1, keepdims=True)
        logp_ref[b] = zm - jnp.log(jnp.sum(jnp.exp(zm), axis=-1, keepdims=True))


# ------------------------------ full forward ----------------------------------
def decoder_forward(packed, y, memory, memory_mask, h0, c0):
    """Mirrors Decoder.forward (eval mode).

    y:           (B, LQ) int32 token ids (lengths unused; packing is a no-op)
    memory:      (B, LK, HID)
    memory_mask: (B, LK) bool, True = padded key position
    h0, c0:      (NUM_LAYERS, B, HID)  (PyTorch `final_hidden` = (h0, c0))
    returns (logprobs (B, LQ, VOCAB), attn_weights (B, LQ, LK))
    """
    # Embedding gather (glue op). Time-major layout so per-timestep gate rows
    # are contiguous sublane windows inside the kernel.
    x_tm = jnp.take(packed["emb"], y.T.reshape(-1), axis=0)   # (LQ*B, EMB)
    maskf = memory_mask.astype(F32)                           # 1.0 = padded key

    logprobs, attn_w = pl.pallas_call(
        _decoder_fused_kernel,
        out_shape=(jax.ShapeDtypeStruct((B, LQ, VOCAB), F32),
                   jax.ShapeDtypeStruct((B, LQ, LK), F32)),
    )(x_tm, h0, c0, memory, maskf,
      packed["wih0"], packed["wslab"], packed["brow"])
    return logprobs, attn_w


# ------------------------------ parameter init ---------------------------------
def init_params(key):
    ks = jax.random.split(key, 20)
    n = lambda k, s: jax.random.normal(k, s, F32) * 0.1
    p = {}
    p["emb"] = n(ks[0], (VOCAB, EMB))
    # LSTM layer 0 (input EMB) and layer 1 (input HID); bias = b_ih + b_hh.
    p["wih0"] = n(ks[1], (EMB, 4 * HID))
    p["whh0"] = n(ks[2], (HID, 4 * HID))
    p["b0"] = n(ks[3], (1, 4 * HID))
    p["wih1"] = n(ks[4], (HID, 4 * HID))
    p["whh1"] = n(ks[5], (HID, 4 * HID))
    p["b1"] = n(ks[6], (1, 4 * HID))
    # MultiheadAttention in/out projections (stored as (in, out)).
    p["wq"] = n(ks[7], (HID, HID)); p["bq"] = n(ks[8], (1, HID))
    p["wk"] = n(ks[9], (HID, HID)); p["bk"] = n(ks[10], (1, HID))
    p["wv"] = n(ks[11], (HID, HID)); p["bv"] = n(ks[12], (1, HID))
    p["wo"] = n(ks[13], (HID, HID)); p["bo"] = n(ks[14], (1, HID))
    # Output linear.
    p["w_out"] = n(ks[15], (HID, VOCAB))
    p["b_out"] = n(ks[16], (1, VOCAB))
    return p


def _pad128(w):
    pad = (-w.shape[1]) % 128
    return jnp.pad(w, ((0, 0), (0, pad))) if pad else w


def pack_params(p):
    """Pack the ~20 tiny weights into 3 DMA-friendly slabs (done once)."""
    wslab = jnp.concatenate([
        p["whh0"],                                             # [  0,128)
        p["wih1"],                                             # [128,256)
        p["whh1"],                                             # [256,384)
        _pad128(jnp.concatenate([p["wk"], p["wv"]], axis=1)),  # [384,512)  K|V
        _pad128(p["wq"]),                                      # [512,640)
        _pad128(p["wo"]),                                      # [640,768)
        _pad128(p["w_out"]),                                   # [768,896)
    ], axis=1)                                                 # (HID, 896)
    brow = jnp.concatenate([
        p["b0"],                                               # [  0,128)
        p["b1"],                                               # [128,256)
        _pad128(jnp.concatenate([p["bk"], p["bv"]], axis=1)),  # [256,384)
        _pad128(p["bq"]),                                      # [384,512)
        _pad128(p["bo"]),                                      # [512,640)
        _pad128(p["b_out"]),                                   # [640,768)
    ], axis=1)                                                 # (1, 768)
    return {"emb": p["emb"], "wih0": p["wih0"], "wslab": wslab, "brow": brow}


# ---------------------------------- main ---------------------------------------
if __name__ == "__main__":
    root = jax.random.PRNGKey(0)
    kp, ky, km, kh, kc = jax.random.split(root, 5)

    packed = pack_params(init_params(kp))

    y = jax.random.randint(ky, (B, LQ), 0, VOCAB, dtype=jnp.int32)
    memory = jax.random.normal(km, (B, LK, HID), F32)
    # key_padding_mask: last 2 positions of batch element 1 are padded.
    memory_mask = jnp.zeros((B, LK), dtype=bool).at[1, LK - 2:].set(True)
    h0 = jax.random.normal(kh, (NUM_LAYERS, B, HID), F32)
    c0 = jax.random.normal(kc, (NUM_LAYERS, B, HID), F32)

    fwd = jax.jit(functools.partial(decoder_forward, packed))
    logprobs, attn_weights = fwd(y, memory, memory_mask, h0, c0)
    jax.block_until_ready((logprobs, attn_weights))

    assert logprobs.shape == (B, LQ, VOCAB)
    assert attn_weights.shape == (B, LQ, LK)
    # log-softmax rows sum to ~1 in prob space; attn weight rows sum to ~1
    # (loose tolerance: softmax uses approximate EUP reciprocal).
    assert jnp.allclose(jnp.sum(jnp.exp(logprobs), axis=-1), 1.0, atol=1e-3)
    assert jnp.allclose(jnp.sum(attn_weights, axis=-1), 1.0, atol=5e-3)
    # padded key positions must receive ~zero attention weight.
    assert float(jnp.max(attn_weights[1, :, LK - 2:])) < 1e-6
    # TODO(synk): pack_padded_sequence / dropout between LSTM layers are
    # training/packing conveniences with no Pallas equivalent (no-ops here).
    print("KERNEL_OK")
</pallas_src>

<mosaic_0001>
module attributes {stable_mosaic.version = 11 : i64} {
  func.func @_decoder_fused_kernel(%arg0: memref<16x16xf32, #tpu.memory_space<vmem>>, %arg1: memref<2x2x32xf32, #tpu.memory_space<vmem>>, %arg2: memref<2x2x32xf32, #tpu.memory_space<vmem>>, %arg3: memref<2x10x32xf32, #tpu.memory_space<vmem>>, %arg4: memref<2x10xf32, #tpu.memory_space<vmem>>, %arg5: memref<16x128xf32, #tpu.memory_space<vmem>>, %arg6: memref<32x896xf32, #tpu.memory_space<vmem>>, %arg7: memref<1x768xf32, #tpu.memory_space<vmem>>, %arg8: memref<2x8x24xf32, #tpu.memory_space<vmem>>, %arg9: memref<2x8x10xf32, #tpu.memory_space<vmem>>) attributes {dimension_semantics = [], scalar_prefetch = 0 : i64, scratch_operands = 0 : i64, tpu.core_type = #tpu.core_type<tc>} {
    %c0 = arith.constant 0 : index
    %c0_0 = arith.constant 0 : index
    %0 = vector.load %arg6[%c0, %c0_0] : memref<32x896xf32, #tpu.memory_space<vmem>>, vector<32x128xf32>
    %1 = arith.truncf %0 : vector<32x128xf32> to vector<32x128xbf16>
    %c0_1 = arith.constant 0 : index
    %c128 = arith.constant 128 : index
    %2 = vector.load %arg6[%c0_1, %c128] : memref<32x896xf32, #tpu.memory_space<vmem>>, vector<32x128xf32>
    %3 = arith.truncf %2 : vector<32x128xf32> to vector<32x128xbf16>
    %c0_2 = arith.constant 0 : index
    %c256 = arith.constant 256 : index
    %4 = vector.load %arg6[%c0_2, %c256] : memref<32x896xf32, #tpu.memory_space<vmem>>, vector<32x128xf32>
    %5 = arith.truncf %4 : vector<32x128xf32> to vector<32x128xbf16>
    %c0_3 = arith.constant 0 : index
    %c384 = arith.constant 384 : index
    %6 = vector.load %arg6[%c0_3, %c384] : memref<32x896xf32, #tpu.memory_space<vmem>>, vector<32x64xf32>
    %7 = arith.truncf %6 : vector<32x64xf32> to vector<32x64xbf16>
    %c0_4 = arith.constant 0 : index
    %c512 = arith.constant 512 : index
    %8 = vector.load %arg6[%c0_4, %c512] : memref<32x896xf32, #tpu.memory_space<vmem>>, vector<32x32xf32>
    %9 = arith.truncf %8 : vector<32x32xf32> to vector<32x32xbf16>
    %c0_5 = arith.constant 0 : index
    %c640 = arith.constant 640 : index
    %10 = vector.load %arg6[%c0_5, %c640] : memref<32x896xf32, #tpu.memory_space<vmem>>, vector<32x32xf32>
    %11 = arith.truncf %10 : vector<32x32xf32> to vector<32x32xbf16>
    %c0_6 = arith.constant 0 : index
    %c768 = arith.constant 768 : index
    %12 = vector.load %arg6[%c0_6, %c768] : memref<32x896xf32, #tpu.memory_space<vmem>>, vector<32x24xf32>
    %13 = arith.truncf %12 : vector<32x24xf32> to vector<32x24xbf16>
    %c0_7 = arith.constant 0 : index
    %c0_8 = arith.constant 0 : index
    %14 = vector.load %arg7[%c0_7, %c0_8] : memref<1x768xf32, #tpu.memory_space<vmem>>, vector<1x128xf32>
    %c0_9 = arith.constant 0 : index
    %c128_10 = arith.constant 128 : index
    %15 = vector.load %arg7[%c0_9, %c128_10] : memref<1x768xf32, #tpu.memory_space<vmem>>, vector<1x128xf32>
    %c0_11 = arith.constant 0 : index
    %c256_12 = arith.constant 256 : index
    %16 = vector.load %arg7[%c0_11, %c256_12] : memref<1x768xf32, #tpu.memory_space<vmem>>, vector<1x64xf32>
    %c0_13 = arith.constant 0 : index
    %c384_14 = arith.constant 384 : index
    %17 = vector.load %arg7[%c0_13, %c384_14] : memref<1x768xf32, #tpu.memory_space<vmem>>, vector<1x32xf32>
    %c0_15 = arith.constant 0 : index
    %c512_16 = arith.constant 512 : index
    %18 = vector.load %arg7[%c0_15, %c512_16] : memref<1x768xf32, #tpu.memory_space<vmem>>, vector<1x32xf32>
    %c0_17 = arith.constant 0 : index
    %c640_18 = arith.constant 640 : index
    %19 = vector.load %arg7[%c0_17, %c640_18] : memref<1x768xf32, #tpu.memory_space<vmem>>, vector<1x24xf32>
    %c0_19 = arith.constant 0 : index
    %c0_20 = arith.constant 0 : index
    %20 = vector.load %arg0[%c0_19, %c0_20] : memref<16x16xf32, #tpu.memory_space<vmem>>, vector<16x16xf32>
    %c0_21 = arith.constant 0 : index
    %c0_22 = arith.constant 0 : index
    %21 = vector.load %arg5[%c0_21, %c0_22] : memref<16x128xf32, #tpu.memory_space<vmem>>, vector<16x128xf32>
    %22 = arith.truncf %20 : vector<16x16xf32> to vector<16x16xbf16>
    %23 = arith.truncf %21 : vector<16x128xf32> to vector<16x128xbf16>
    %cst = arith.constant dense<0.000000e+00> : vector<16x128xf32>
    %24 = tpu.matmul %22, %23, %cst {dimension_numbers = #tpu.dot_dimension_numbers<[1], [0], [0], [1], [0, 0, 1, 1], [], []>} : vector<16x16xbf16>, vector<16x128xbf16>, vector<16x128xf32> -> vector<16x128xf32>
    %25 = vector.broadcast %14 : vector<1x128xf32> to vector<16x128xf32>
    %26 = arith.addf %24, %25 : vector<16x128xf32>
    %c0_23 = arith.constant 0 : index
    %c0_24 = arith.constant 0 : index
    %c0_25 = arith.constant 0 : index
    %27 = vector.load %arg1[%c0_23, %c0_24, %c0_25] : memref<2x2x32xf32, #tpu.memory_space<vmem>>, vector<1x2x32xf32>
    %28 = vector.shape_cast %27 : vector<1x2x32xf32> to vector<2x32xf32>
    %c0_26 = arith.constant 0 : index
    %c0_27 = arith.constant 0 : index
    %c0_28 = arith.constant 0 : index
    %29 = vector.load %arg2[%c0_26, %c0_27, %c0_28] : memref<2x2x32xf32, #tpu.memory_space<vmem>>, vector<1x2x32xf32>
    %30 = vector.shape_cast %29 : vector<1x2x32xf32> to vector<2x32xf32>
    %31 = vector.extract_strided_slice %26 {offsets = [0, 0], sizes = [2, 128], strides = [1, 1]} : vector<16x128xf32> to vector<2x128xf32>
    %32 = arith.truncf %28 : vector<2x32xf32> to vector<2x32xbf16>
    %cst_29 = arith.constant dense<0.000000e+00> : vector<2x128xf32>
    %33 = tpu.matmul %32, %1, %cst_29 {dimension_numbers = #tpu.dot_dimension_numbers<[1], [0], [0], [1], [0, 0, 1, 1], [], []>} : vector<2x32xbf16>, vector<32x128xbf16>, vector<2x128xf32> -> vector<2x128xf32>
    %34 = arith.addf %31, %33 : vector<2x128xf32>
    %35 = arith.negf %34 : vector<2x128xf32>
    %36 = math.exp %35 : vector<2x128xf32>
    %cst_30 = arith.constant 1.000000e+00 : f32
    %37 = vector.broadcast %cst_30 : f32 to vector<2x128xf32>
    %38 = arith.addf %37, %36 : vector<2x128xf32>
    %39 = arith.divf %37, %38 : vector<2x128xf32>
    %40 = math.tanh %34 : vector<2x128xf32>
    %41 = vector.extract_strided_slice %39 {offsets = [0, 0], sizes = [2, 32], strides = [1, 1]} : vector<2x128xf32> to vector<2x32xf32>
    %42 = vector.extract_strided_slice %39 {offsets = [0, 32], sizes = [2, 32], strides = [1, 1]} : vector<2x128xf32> to vector<2x32xf32>
    %43 = vector.extract_strided_slice %40 {offsets = [0, 64], sizes = [2, 32], strides = [1, 1]} : vector<2x128xf32> to vector<2x32xf32>
    %44 = vector.extract_strided_slice %39 {offsets = [0, 96], sizes = [2, 32], strides = [1, 1]} : vector<2x128xf32> to vector<2x32xf32>
    %45 = arith.mulf %42, %30 : vector<2x32xf32>
    %46 = arith.mulf %41, %43 : vector<2x32xf32>
    %47 = arith.addf %45, %46 : vector<2x32xf32>
    %48 = math.tanh %47 : vector<2x32xf32>
    %49 = arith.mulf %44, %48 : vector<2x32xf32>
    %50 = vector.extract_strided_slice %26 {offsets = [2, 0], sizes = [2, 128], strides = [1, 1]} : vector<16x128xf32> to vector<2x128xf32>
    %51 = arith.truncf %49 : vector<2x32xf32> to vector<2x32xbf16>
    %cst_31 = arith.constant dense<0.000000e+00> : vector<2x128xf32>
    %52 = tpu.matmul %51, %1, %cst_31 {dimension_numbers = #tpu.dot_dimension_numbers<[1], [0], [0], [1], [0, 0, 1, 1], [], []>} : vector<2x32xbf16>, vector<32x128xbf16>, vector<2x128xf32> -> vector<2x128xf32>
    %53 = arith.addf %50, %52 : vector<2x128xf32>
    %54 = arith.negf %53 : vector<2x128xf32>
    %55 = math.exp %54 : vector<2x128xf32>
    %cst_32 = arith.constant 1.000000e+00 : f32
    %56 = vector.broadcast %cst_32 : f32 to vector<2x128xf32>
    %57 = arith.addf %56, %55 : vector<2x128xf32>
    %58 = arith.divf %56, %57 : vector<2x128xf32>
    %59 = math.tanh %53 : vector<2x128xf32>
    %60 = vector.extract_strided_slice %58 {offsets = [0, 0], sizes = [2, 32], strides = [1, 1]} : vector<2x128xf32> to vector<2x32xf32>
    %61 = vector.extract_strided_slice %58 {offsets = [0, 32], sizes = [2, 32], strides = [1, 1]} : vector<2x128xf32> to vector<2x32xf32>
    %62 = vector.extract_strided_slice %59 {offsets = [0, 64], sizes = [2, 32], strides = [1, 1]} : vector<2x128xf32> to vector<2x32xf32>
    %63 = vector.extract_strided_slice %58 {offsets = [0, 96], sizes = [2, 32], strides = [1, 1]} : vector<2x128xf32> to vector<2x32xf32>
    %64 = arith.mulf %61, %47 : vector<2x32xf32>
    %65 = arith.mulf %60, %62 : vector<2x32xf32>
    %66 = arith.addf %64, %65 : vector<2x32xf32>
    %67 = math.tanh %66 : vector<2x32xf32>
    %68 = arith.mulf %63, %67 : vector<2x32xf32>
    %69 = vector.extract_strided_slice %26 {offsets = [4, 0], sizes = [2, 128], strides = [1, 1]} : vector<16x128xf32> to vector<2x128xf32>
    %70 = arith.truncf %68 : vector<2x32xf32> to vector<2x32xbf16>
    %cst_33 = arith.constant dense<0.000000e+00> : vector<2x128xf32>
    %71 = tpu.matmul %70, %1, %cst_33 {dimension_numbers = #tpu.dot_dimension_numbers<[1], [0], [0], [1], [0, 0, 1, 1], [], []>} : vector<2x32xbf16>, vector<32x128xbf16>, vector<2x128xf32> -> vector<2x128xf32>
    %72 = arith.addf %69, %71 : vector<2x128xf32>
    %73 = arith.negf %72 : vector<2x128xf32>
    %74 = math.exp %73 : vector<2x128xf32>
    %cst_34 = arith.constant 1.000000e+00 : f32
    %75 = vector.broadcast %cst_34 : f32 to vector<2x128xf32>
    %76 = arith.addf %75, %74 : vector<2x128xf32>
    %77 = arith.divf %75, %76 : vector<2x128xf32>
    %78 = math.tanh %72 : vector<2x128xf32>
    %79 = vector.extract_strided_slice %77 {offsets = [0, 0], sizes = [2, 32], strides = [1, 1]} : vector<2x128xf32> to vector<2x32xf32>
    %80 = vector.extract_strided_slice %77 {offsets = [0, 32], sizes = [2, 32], strides = [1, 1]} : vector<2x128xf32> to vector<2x32xf32>
    %81 = vector.extract_strided_slice %78 {offsets = [0, 64], sizes = [2, 32], strides = [1, 1]} : vector<2x128xf32> to vector<2x32xf32>
    %82 = vector.extract_strided_slice %77 {offsets = [0, 96], sizes = [2, 32], strides = [1, 1]} : vector<2x128xf32> to vector<2x32xf32>
    %83 = arith.mulf %80, %66 : vector<2x32xf32>
    %84 = arith.mulf %79, %81 : vector<2x32xf32>
    %85 = arith.addf %83, %84 : vector<2x32xf32>
    %86 = math.tanh %85 : vector<2x32xf32>
    %87 = arith.mulf %82, %86 : vector<2x32xf32>
    %88 = vector.extract_strided_slice %26 {offsets = [6, 0], sizes = [2, 128], strides = [1, 1]} : vector<16x128xf32> to vector<2x128xf32>
    %89 = arith.truncf %87 : vector<2x32xf32> to vector<2x32xbf16>
    %cst_35 = arith.constant dense<0.000000e+00> : vector<2x128xf32>
    %90 = tpu.matmul %89, %1, %cst_35 {dimension_numbers = #tpu.dot_dimension_numbers<[1], [0], [0], [1], [0, 0, 1, 1], [], []>} : vector<2x32xbf16>, vector<32x128xbf16>, vector<2x128xf32> -> vector<2x128xf32>
    %91 = arith.addf %88, %90 : vector<2x128xf32>
    %92 = arith.negf %91 : vector<2x128xf32>
    %93 = math.exp %92 : vector<2x128xf32>
    %cst_36 = arith.constant 1.000000e+00 : f32
    %94 = vector.broadcast %cst_36 : f32 to vector<2x128xf32>
    %95 = arith.addf %94, %93 : vector<2x128xf32>
    %96 = arith.divf %94, %95 : vector<2x128xf32>
    %97 = math.tanh %91 : vector<2x128xf32>
    %98 = vector.extract_strided_slice %96 {offsets = [0, 0], sizes = [2, 32], strides = [1, 1]} : vector<2x128xf32> to vector<2x32xf32>
    %99 = vector.extract_strided_slice %96 {offsets = [0, 32], sizes = [2, 32], strides = [1, 1]} : vector<2x128xf32> to vector<2x32xf32>
    %100 = vector.extract_strided_slice %97 {offsets = [0, 64], sizes = [2, 32], strides = [1, 1]} : vector<2x128xf32> to vector<2x32xf32>
    %101 = vector.extract_strided_slice %96 {offsets = [0, 96], sizes = [2, 32], strides = [1, 1]} : vector<2x128xf32> to vector<2x32xf32>
    %102 = arith.mulf %99, %85 : vector<2x32xf32>
    %103 = arith.mulf %98, %100 : vector<2x32xf32>
    %104 = arith.addf %102, %103 : vector<2x32xf32>
    %105 = math.tanh %104 : vector<2x32xf32>
    %106 = arith.mulf %101, %105 : vector<2x32xf32>
    %107 = vector.extract_strided_slice %26 {offsets = [8, 0], sizes = [2, 128], strides = [1, 1]} : vector<16x128xf32> to vector<2x128xf32>
    %108 = arith.truncf %106 : vector<2x32xf32> to vector<2x32xbf16>
    %cst_37 = arith.constant dense<0.000000e+00> : vector<2x128xf32>
    %109 = tpu.matmul %108, %1, %cst_37 {dimension_numbers = #tpu.dot_dimension_numbers<[1], [0], [0], [1], [0, 0, 1, 1], [], []>} : vector<2x32xbf16>, vector<32x128xbf16>, vector<2x128xf32> -> vector<2x128xf32>
    %110 = arith.addf %107, %109 : vector<2x128xf32>
    %111 = arith.negf %110 : vector<2x128xf32>
    %112 = math.exp %111 : vector<2x128xf32>
    %cst_38 = arith.constant 1.000000e+00 : f32
    %113 = vector.broadcast %cst_38 : f32 to vector<2x128xf32>
    %114 = arith.addf %113, %112 : vector<2x128xf32>
    %115 = arith.divf %113, %114 : vector<2x128xf32>
    %116 = math.tanh %110 : vector<2x128xf32>
    %117 = vector.extract_strided_slice %115 {offsets = [0, 0], sizes = [2, 32], strides = [1, 1]} : vector<2x128xf32> to vector<2x32xf32>
    %118 = vector.extract_strided_slice %115 {offsets = [0, 32], sizes = [2, 32], strides = [1, 1]} : vector<2x128xf32> to vector<2x32xf32>
    %119 = vector.extract_strided_slice %116 {offsets = [0, 64], sizes = [2, 32], strides = [1, 1]} : vector<2x128xf32> to vector<2x32xf32>
    %120 = vector.extract_strided_slice %115 {offsets = [0, 96], sizes = [2, 32], strides = [1, 1]} : vector<2x128xf32> to vector<2x32xf32>
    %121 = arith.mulf %118, %104 : vector<2x32xf32>
    %122 = arith.mulf %117, %119 : vector<2x32xf32>
    %123 = arith.addf %121, %122 : vector<2x32xf32>
    %124 = math.tanh %123 : vector<2x32xf32>
    %125 = arith.mulf %120, %124 : vector<2x32xf32>
    %126 = vector.extract_strided_slice %26 {offsets = [10, 0], sizes = [2, 128], strides = [1, 1]} : vector<16x128xf32> to vector<2x128xf32>
    %127 = arith.truncf %125 : vector<2x32xf32> to vector<2x32xbf16>
    %cst_39 = arith.constant dense<0.000000e+00> : vector<2x128xf32>
    %128 = tpu.matmul %127, %1, %cst_39 {dimension_numbers = #tpu.dot_dimension_numbers<[1], [0], [0], [1], [0, 0, 1, 1], [], []>} : vector<2x32xbf16>, vector<32x128xbf16>, vector<2x128xf32> -> vector<2x128xf32>
    %129 = arith.addf %126, %128 : vector<2x128xf32>
    %130 = arith.negf %129 : vector<2x128xf32>
    %131 = math.exp %130 : vector<2x128xf32>
    %cst_40 = arith.constant 1.000000e+00 : f32
    %132 = vector.broadcast %cst_40 : f32 to vector<2x128xf32>
    %133 = arith.addf %132, %131 : vector<2x128xf32>
    %134 = arith.divf %132, %133 : vector<2x128xf32>
    %135 = math.tanh %129 : vector<2x128xf32>
    %136 = vector.extract_strided_slice %134 {offsets = [0, 0], sizes = [2, 32], strides = [1, 1]} : vector<2x128xf32> to vector<2x32xf32>
    %137 = vector.extract_strided_slice %134 {offsets = [0, 32], sizes = [2, 32], strides = [1, 1]} : vector<2x128xf32> to vector<2x32xf32>
    %138 = vector.extract_strided_slice %135 {offsets = [0, 64], sizes = [2, 32], strides = [1, 1]} : vector<2x128xf32> to vector<2x32xf32>
    %139 = vector.extract_strided_slice %134 {offsets = [0, 96], sizes = [2, 32], strides = [1, 1]} : vector<2x128xf32> to vector<2x32xf32>
    %140 = arith.mulf %137, %123 : vector<2x32xf32>
    %141 = arith.mulf %136, %138 : vector<2x32xf32>
    %142 = arith.addf %140, %141 : vector<2x32xf32>
    %143 = math.tanh %142 : vector<2x32xf32>
    %144 = arith.mulf %139, %143 : vector<2x32xf32>
    %145 = vector.extract_strided_slice %26 {offsets = [12, 0], sizes = [2, 128], strides = [1, 1]} : vector<16x128xf32> to vector<2x128xf32>
    %146 = arith.truncf %144 : vector<2x32xf32> to vector<2x32xbf16>
    %cst_41 = arith.constant dense<0.000000e+00> : vector<2x128xf32>
    %147 = tpu.matmul %146, %1, %cst_41 {dimension_numbers = #tpu.dot_dimension_numbers<[1], [0], [0], [1], [0, 0, 1, 1], [], []>} : vector<2x32xbf16>, vector<32x128xbf16>, vector<2x128xf32> -> vector<2x128xf32>
    %148 = arith.addf %145, %147 : vector<2x128xf32>
    %149 = arith.negf %148 : vector<2x128xf32>
    %150 = math.exp %149 : vector<2x128xf32>
    %cst_42 = arith.constant 1.000000e+00 : f32
    %151 = vector.broadcast %cst_42 : f32 to vector<2x128xf32>
    %152 = arith.addf %151, %150 : vector<2x128xf32>
    %153 = arith.divf %151, %152 : vector<2x128xf32>
    %154 = math.tanh %148 : vector<2x128xf32>
    %155 = vector.extract_strided_slice %153 {offsets = [0, 0], sizes = [2, 32], strides = [1, 1]} : vector<2x128xf32> to vector<2x32xf32>
    %156 = vector.extract_strided_slice %153 {offsets = [0, 32], sizes = [2, 32], strides = [1, 1]} : vector<2x128xf32> to vector<2x32xf32>
    %157 = vector.extract_strided_slice %154 {offsets = [0, 64], sizes = [2, 32], strides = [1, 1]} : vector<2x128xf32> to vector<2x32xf32>
    %158 = vector.extract_strided_slice %153 {offsets = [0, 96], sizes = [2, 32], strides = [1, 1]} : vector<2x128xf32> to vector<2x32xf32>
    %159 = arith.mulf %156, %142 : vector<2x32xf32>
    %160 = arith.mulf %155, %157 : vector<2x32xf32>
    %161 = arith.addf %159, %160 : vector<2x32xf32>
    %162 = math.tanh %161 : vector<2x32xf32>
    %163 = arith.mulf %158, %162 : vector<2x32xf32>
    %164 = vector.extract_strided_slice %26 {offsets = [14, 0], sizes = [2, 128], strides = [1, 1]} : vector<16x128xf32> to vector<2x128xf32>
    %165 = arith.truncf %163 : vector<2x32xf32> to vector<2x32xbf16>
    %cst_43 = arith.constant dense<0.000000e+00> : vector<2x128xf32>
    %166 = tpu.matmul %165, %1, %cst_43 {dimension_numbers = #tpu.dot_dimension_numbers<[1], [0], [0], [1], [0, 0, 1, 1], [], []>} : vector<2x32xbf16>, vector<32x128xbf16>, vector<2x128xf32> -> vector<2x128xf32>
    %167 = arith.addf %164, %166 : vector<2x128xf32>
    %168 = arith.negf %167 : vector<2x128xf32>
    %169 = math.exp %168 : vector<2x128xf32>
    %cst_44 = arith.constant 1.000000e+00 : f32
    %170 = vector.broadcast %cst_44 : f32 to vector<2x128xf32>
    %171 = arith.addf %170, %169 : vector<2x128xf32>
    %172 = arith.divf %170, %171 : vector<2x128xf32>
    %173 = math.tanh %167 : vector<2x128xf32>
    %174 = vector.extract_strided_slice %172 {offsets = [0, 0], sizes = [2, 32], strides = [1, 1]} : vector<2x128xf32> to vector<2x32xf32>
    %175 = vector.extract_strided_slice %172 {offsets = [0, 32], sizes = [2, 32], strides = [1, 1]} : vector<2x128xf32> to vector<2x32xf32>
    %176 = vector.extract_strided_slice %173 {offsets = [0, 64], sizes = [2, 32], strides = [1, 1]} : vector<2x128xf32> to vector<2x32xf32>
    %177 = vector.extract_strided_slice %172 {offsets = [0, 96], sizes = [2, 32], strides = [1, 1]} : vector<2x128xf32> to vector<2x32xf32>
    %178 = arith.mulf %175, %161 : vector<2x32xf32>
    %179 = arith.mulf %174, %176 : vector<2x32xf32>
    %180 = arith.addf %178, %179 : vector<2x32xf32>
    %181 = math.tanh %180 : vector<2x32xf32>
    %182 = arith.mulf %177, %181 : vector<2x32xf32>
    %183 = tpu.concatenate %49, %68, %87, %106, %125, %144, %163, %182 in 0 : vector<2x32xf32>, vector<2x32xf32>, vector<2x32xf32>, vector<2x32xf32>, vector<2x32xf32>, vector<2x32xf32>, vector<2x32xf32>, vector<2x32xf32> -> vector<16x32xf32>
    %184 = arith.truncf %183 : vector<16x32xf32> to vector<16x32xbf16>
    %cst_45 = arith.constant dense<0.000000e+00> : vector<16x128xf32>
    %185 = tpu.matmul %184, %3, %cst_45 {dimension_numbers = #tpu.dot_dimension_numbers<[1], [0], [0], [1], [0, 0, 1, 1], [], []>} : vector<16x32xbf16>, vector<32x128xbf16>, vector<16x128xf32> -> vector<16x128xf32>
    %186 = vector.broadcast %15 : vector<1x128xf32> to vector<16x128xf32>
    %187 = arith.addf %185, %186 : vector<16x128xf32>
    %c1 = arith.constant 1 : index
    %c0_46 = arith.constant 0 : index
    %c0_47 = arith.constant 0 : index
    %188 = vector.load %arg1[%c1, %c0_46, %c0_47] : memref<2x2x32xf32, #tpu.memory_space<vmem>>, vector<1x2x32xf32>
    %189 = vector.shape_cast %188 : vector<1x2x32xf32> to vector<2x32xf32>
    %c1_48 = arith.constant 1 : index
    %c0_49 = arith.constant 0 : index
    %c0_50 = arith.constant 0 : index
    %190 = vector.load %arg2[%c1_48, %c0_49, %c0_50] : memref<2x2x32xf32, #tpu.memory_space<vmem>>, vector<1x2x32xf32>
    %191 = vector.shape_cast %190 : vector<1x2x32xf32> to vector<2x32xf32>
    %192 = vector.extract_strided_slice %187 {offsets = [0, 0], sizes = [2, 128], strides = [1, 1]} : vector<16x128xf32> to vector<2x128xf32>
    %193 = arith.truncf %189 : vector<2x32xf32> to vector<2x32xbf16>
    %cst_51 = arith.constant dense<0.000000e+00> : vector<2x128xf32>
    %194 = tpu.matmul %193, %5, %cst_51 {dimension_numbers = #tpu.dot_dimension_numbers<[1], [0], [0], [1], [0, 0, 1, 1], [], []>} : vector<2x32xbf16>, vector<32x128xbf16>, vector<2x128xf32> -> vector<2x128xf32>
    %195 = arith.addf %192, %194 : vector<2x128xf32>
    %196 = arith.negf %195 : vector<2x128xf32>
    %197 = math.exp %196 : vector<2x128xf32>
    %cst_52 = arith.constant 1.000000e+00 : f32
    %198 = vector.broadcast %cst_52 : f32 to vector<2x128xf32>
    %199 = arith.addf %198, %197 : vector<2x128xf32>
    %200 = arith.divf %198, %199 : vector<2x128xf32>
    %201 = math.tanh %195 : vector<2x128xf32>
    %202 = vector.extract_strided_slice %200 {offsets = [0, 0], sizes = [2, 32], strides = [1, 1]} : vector<2x128xf32> to vector<2x32xf32>
    %203 = vector.extract_strided_slice %200 {offsets = [0, 32], sizes = [2, 32], strides = [1, 1]} : vector<2x128xf32> to vector<2x32xf32>
    %204 = vector.extract_strided_slice %201 {offsets = [0, 64], sizes = [2, 32], strides = [1, 1]} : vector<2x128xf32> to vector<2x32xf32>
    %205 = vector.extract_strided_slice %200 {offsets = [0, 96], sizes = [2, 32], strides = [1, 1]} : vector<2x128xf32> to vector<2x32xf32>
    %206 = arith.mulf %203, %191 : vector<2x32xf32>
    %207 = arith.mulf %202, %204 : vector<2x32xf32>
    %208 = arith.addf %206, %207 : vector<2x32xf32>
    %209 = math.tanh %208 : vector<2x32xf32>
    %210 = arith.mulf %205, %209 : vector<2x32xf32>
    %211 = vector.extract_strided_slice %187 {offsets = [2, 0], sizes = [2, 128], strides = [1, 1]} : vector<16x128xf32> to vector<2x128xf32>
    %212 = arith.truncf %210 : vector<2x32xf32> to vector<2x32xbf16>
    %cst_53 = arith.constant dense<0.000000e+00> : vector<2x128xf32>
    %213 = tpu.matmul %212, %5, %cst_53 {dimension_numbers = #tpu.dot_dimension_numbers<[1], [0], [0], [1], [0, 0, 1, 1], [], []>} : vector<2x32xbf16>, vector<32x128xbf16>, vector<2x128xf32> -> vector<2x128xf32>
    %214 = arith.addf %211, %213 : vector<2x128xf32>
    %215 = arith.negf %214 : vector<2x128xf32>
    %216 = math.exp %215 : vector<2x128xf32>
    %cst_54 = arith.constant 1.000000e+00 : f32
    %217 = vector.broadcast %cst_54 : f32 to vector<2x128xf32>
    %218 = arith.addf %217, %216 : vector<2x128xf32>
    %219 = arith.divf %217, %218 : vector<2x128xf32>
    %220 = math.tanh %214 : vector<2x128xf32>
    %221 = vector.extract_strided_slice %219 {offsets = [0, 0], sizes = [2, 32], strides = [1, 1]} : vector<2x128xf32> to vector<2x32xf32>
    %222 = vector.extract_strided_slice %219 {offsets = [0, 32], sizes = [2, 32], strides = [1, 1]} : vector<2x128xf32> to vector<2x32xf32>
    %223 = vector.extract_strided_slice %220 {offsets = [0, 64], sizes = [2, 32], strides = [1, 1]} : vector<2x128xf32> to vector<2x32xf32>
    %224 = vector.extract_strided_slice %219 {offsets = [0, 96], sizes = [2, 32], strides = [1, 1]} : vector<2x128xf32> to vector<2x32xf32>
    %225 = arith.mulf %222, %208 : vector<2x32xf32>
    %226 = arith.mulf %221, %223 : vector<2x32xf32>
    %227 = arith.addf %225, %226 : vector<2x32xf32>
    %228 = math.tanh %227 : vector<2x32xf32>
    %229 = arith.mulf %224, %228 : vector<2x32xf32>
    %230 = vector.extract_strided_slice %187 {offsets = [4, 0], sizes = [2, 128], strides = [1, 1]} : vector<16x128xf32> to vector<2x128xf32>
    %231 = arith.truncf %229 : vector<2x32xf32> to vector<2x32xbf16>
    %cst_55 = arith.constant dense<0.000000e+00> : vector<2x128xf32>
    %232 = tpu.matmul %231, %5, %cst_55 {dimension_numbers = #tpu.dot_dimension_numbers<[1], [0], [0], [1], [0, 0, 1, 1], [], []>} : vector<2x32xbf16>, vector<32x128xbf16>, vector<2x128xf32> -> vector<2x128xf32>
    %233 = arith.addf %230, %232 : vector<2x128xf32>
    %234 = arith.negf %233 : vector<2x128xf32>
    %235 = math.exp %234 : vector<2x128xf32>
    %cst_56 = arith.constant 1.000000e+00 : f32
    %236 = vector.broadcast %cst_56 : f32 to vector<2x128xf32>
    %237 = arith.addf %236, %235 : vector<2x128xf32>
    %238 = arith.divf %236, %237 : vector<2x128xf32>
    %239 = math.tanh %233 : vector<2x128xf32>
    %240 = vector.extract_strided_slice %238 {offsets = [0, 0], sizes = [2, 32], strides = [1, 1]} : vector<2x128xf32> to vector<2x32xf32>
    %241 = vector.extract_strided_slice %238 {offsets = [0, 32], sizes = [2, 32], strides = [1, 1]} : vector<2x128xf32> to vector<2x32xf32>
    %242 = vector.extract_strided_slice %239 {offsets = [0, 64], sizes = [2, 32], strides = [1, 1]} : vector<2x128xf32> to vector<2x32xf32>
    %243 = vector.extract_strided_slice %238 {offsets = [0, 96], sizes = [2, 32], strides = [1, 1]} : vector<2x128xf32> to vector<2x32xf32>
    %244 = arith.mulf %241, %227 : vector<2x32xf32>
    %245 = arith.mulf %240, %242 : vector<2x32xf32>
    %246 = arith.addf %244, %245 : vector<2x32xf32>
    %247 = math.tanh %246 : vector<2x32xf32>
    %248 = arith.mulf %243, %247 : vector<2x32xf32>
    %249 = vector.extract_strided_slice %187 {offsets = [6, 0], sizes = [2, 128], strides = [1, 1]} : vector<16x128xf32> to vector<2x128xf32>
    %250 = arith.truncf %248 : vector<2x32xf32> to vector<2x32xbf16>
    %cst_57 = arith.constant dense<0.000000e+00> : vector<2x128xf32>
    %251 = tpu.matmul %250, %5, %cst_57 {dimension_numbers = #tpu.dot_dimension_numbers<[1], [0], [0], [1], [0, 0, 1, 1], [], []>} : vector<2x32xbf16>, vector<32x128xbf16>, vector<2x128xf32> -> vector<2x128xf32>
    %252 = arith.addf %249, %251 : vector<2x128xf32>
    %253 = arith.negf %252 : vector<2x128xf32>
    %254 = math.exp %253 : vector<2x128xf32>
    %cst_58 = arith.constant 1.000000e+00 : f32
    %255 = vector.broadcast %cst_58 : f32 to vector<2x128xf32>
    %256 = arith.addf %255, %254 : vector<2x128xf32>
    %257 = arith.divf %255, %256 : vector<2x128xf32>
    %258 = math.tanh %252 : vector<2x128xf32>
    %259 = vector.extract_strided_slice %257 {offsets = [0, 0], sizes = [2, 32], strides = [1, 1]} : vector<2x128xf32> to vector<2x32xf32>
    %260 = vector.extract_strided_slice %257 {offsets = [0, 32], sizes = [2, 32], strides = [1, 1]} : vector<2x128xf32> to vector<2x32xf32>
    %261 = vector.extract_strided_slice %258 {offsets = [0, 64], sizes = [2, 32], strides = [1, 1]} : vector<2x128xf32> to vector<2x32xf32>
    %262 = vector.extract_strided_slice %257 {offsets = [0, 96], sizes = [2, 32], strides = [1, 1]} : vector<2x128xf32> to vector<2x32xf32>
    %263 = arith.mulf %260, %246 : vector<2x32xf32>
    %264 = arith.mulf %259, %261 : vector<2x32xf32>
    %265 = arith.addf %263, %264 : vector<2x32xf32>
    %266 = math.tanh %265 : vector<2x32xf32>
    %267 = arith.mulf %262, %266 : vector<2x32xf32>
    %268 = vector.extract_strided_slice %187 {offsets = [8, 0], sizes = [2, 128], strides = [1, 1]} : vector<16x128xf32> to vector<2x128xf32>
    %269 = arith.truncf %267 : vector<2x32xf32> to vector<2x32xbf16>
    %cst_59 = arith.constant dense<0.000000e+00> : vector<2x128xf32>
    %270 = tpu.matmul %269, %5, %cst_59 {dimension_numbers = #tpu.dot_dimension_numbers<[1], [0], [0], [1], [0, 0, 1, 1], [], []>} : vector<2x32xbf16>, vector<32x128xbf16>, vector<2x128xf32> -> vector<2x128xf32>
    %271 = arith.addf %268, %270 : vector<2x128xf32>
    %272 = arith.negf %271 : vector<2x128xf32>
    %273 = math.exp %272 : vector<2x128xf32>
    %cst_60 = arith.constant 1.000000e+00 : f32
    %274 = vector.broadcast %cst_60 : f32 to vector<2x128xf32>
    %275 = arith.addf %274, %273 : vector<2x128xf32>
    %276 = arith.divf %274, %275 : vector<2x128xf32>
    %277 = math.tanh %271 : vector<2x128xf32>
    %278 = vector.extract_strided_slice %276 {offsets = [0, 0], sizes = [2, 32], strides = [1, 1]} : vector<2x128xf32> to vector<2x32xf32>
    %279 = vector.extract_strided_slice %276 {offsets = [0, 32], sizes = [2, 32], strides = [1, 1]} : vector<2x128xf32> to vector<2x32xf32>
    %280 = vector.extract_strided_slice %277 {offsets = [0, 64], sizes = [2, 32], strides = [1, 1]} : vector<2x128xf32> to vector<2x32xf32>
    %281 = vector.extract_strided_slice %276 {offsets = [0, 96], sizes = [2, 32], strides = [1, 1]} : vector<2x128xf32> to vector<2x32xf32>
    %282 = arith.mulf %279, %265 : vector<2x32xf32>
    %283 = arith.mulf %278, %280 : vector<2x32xf32>
    %284 = arith.addf %282, %283 : vector<2x32xf32>
    %285 = math.tanh %284 : vector<2x32xf32>
    %286 = arith.mulf %281, %285 : vector<2x32xf32>
    %287 = vector.extract_strided_slice %187 {offsets = [10, 0], sizes = [2, 128], strides = [1, 1]} : vector<16x128xf32> to vector<2x128xf32>
    %288 = arith.truncf %286 : vector<2x32xf32> to vector<2x32xbf16>
    %cst_61 = arith.constant dense<0.000000e+00> : vector<2x128xf32>
    %289 = tpu.matmul %288, %5, %cst_61 {dimension_numbers = #tpu.dot_dimension_numbers<[1], [0], [0], [1], [0, 0, 1, 1], [], []>} : vector<2x32xbf16>, vector<32x128xbf16>, vector<2x128xf32> -> vector<2x128xf32>
    %290 = arith.addf %287, %289 : vector<2x128xf32>
    %291 = arith.negf %290 : vector<2x128xf32>
    %292 = math.exp %291 : vector<2x128xf32>
    %cst_62 = arith.constant 1.000000e+00 : f32
    %293 = vector.broadcast %cst_62 : f32 to vector<2x128xf32>
    %294 = arith.addf %293, %292 : vector<2x128xf32>
    %295 = arith.divf %293, %294 : vector<2x128xf32>
    %296 = math.tanh %290 : vector<2x128xf32>
    %297 = vector.extract_strided_slice %295 {offsets = [0, 0], sizes = [2, 32], strides = [1, 1]} : vector<2x128xf32> to vector<2x32xf32>
    %298 = vector.extract_strided_slice %295 {offsets = [0, 32], sizes = [2, 32], strides = [1, 1]} : vector<2x128xf32> to vector<2x32xf32>
    %299 = vector.extract_strided_slice %296 {offsets = [0, 64], sizes = [2, 32], strides = [1, 1]} : vector<2x128xf32> to vector<2x32xf32>
    %300 = vector.extract_strided_slice %295 {offsets = [0, 96], sizes = [2, 32], strides = [1, 1]} : vector<2x128xf32> to vector<2x32xf32>
    %301 = arith.mulf %298, %284 : vector<2x32xf32>
    %302 = arith.mulf %297, %299 : vector<2x32xf32>
    %303 = arith.addf %301, %302 : vector<2x32xf32>
    %304 = math.tanh %303 : vector<2x32xf32>
    %305 = arith.mulf %300, %304 : vector<2x32xf32>
    %306 = vector.extract_strided_slice %187 {offsets = [12, 0], sizes = [2, 128], strides = [1, 1]} : vector<16x128xf32> to vector<2x128xf32>
    %307 = arith.truncf %305 : vector<2x32xf32> to vector<2x32xbf16>
    %cst_63 = arith.constant dense<0.000000e+00> : vector<2x128xf32>
    %308 = tpu.matmul %307, %5, %cst_63 {dimension_numbers = #tpu.dot_dimension_numbers<[1], [0], [0], [1], [0, 0, 1, 1], [], []>} : vector<2x32xbf16>, vector<32x128xbf16>, vector<2x128xf32> -> vector<2x128xf32>
    %309 = arith.addf %306, %308 : vector<2x128xf32>
    %310 = arith.negf %309 : vector<2x128xf32>
    %311 = math.exp %310 : vector<2x128xf32>
    %cst_64 = arith.constant 1.000000e+00 : f32
    %312 = vector.broadcast %cst_64 : f32 to vector<2x128xf32>
    %313 = arith.addf %312, %311 : vector<2x128xf32>
    %314 = arith.divf %312, %313 : vector<2x128xf32>
    %315 = math.tanh %309 : vector<2x128xf32>
    %316 = vector.extract_strided_slice %314 {offsets = [0, 0], sizes = [2, 32], strides = [1, 1]} : vector<2x128xf32> to vector<2x32xf32>
    %317 = vector.extract_strided_slice %314 {offsets = [0, 32], sizes = [2, 32], strides = [1, 1]} : vector<2x128xf32> to vector<2x32xf32>
    %318 = vector.extract_strided_slice %315 {offsets = [0, 64], sizes = [2, 32], strides = [1, 1]} : vector<2x128xf32> to vector<2x32xf32>
    %319 = vector.extract_strided_slice %314 {offsets = [0, 96], sizes = [2, 32], strides = [1, 1]} : vector<2x128xf32> to vector<2x32xf32>
    %320 = arith.mulf %317, %303 : vector<2x32xf32>
    %321 = arith.mulf %316, %318 : vector<2x32xf32>
    %322 = arith.addf %320, %321 : vector<2x32xf32>
    %323 = math.tanh %322 : vector<2x32xf32>
    %324 = arith.mulf %319, %323 : vector<2x32xf32>
    %325 = vector.extract_strided_slice %187 {offsets = [14, 0], sizes = [2, 128], strides = [1, 1]} : vector<16x128xf32> to vector<2x128xf32>
    %326 = arith.truncf %324 : vector<2x32xf32> to vector<2x32xbf16>
    %cst_65 = arith.constant dense<0.000000e+00> : vector<2x128xf32>
    %327 = tpu.matmul %326, %5, %cst_65 {dimension_numbers = #tpu.dot_dimension_numbers<[1], [0], [0], [1], [0, 0, 1, 1], [], []>} : vector<2x32xbf16>, vector<32x128xbf16>, vector<2x128xf32> -> vector<2x128xf32>
    %328 = arith.addf %325, %327 : vector<2x128xf32>
    %329 = arith.negf %328 : vector<2x128xf32>
    %330 = math.exp %329 : vector<2x128xf32>
    %cst_66 = arith.constant 1.000000e+00 : f32
    %331 = vector.broadcast %cst_66 : f32 to vector<2x128xf32>
    %332 = arith.addf %331, %330 : vector<2x128xf32>
    %333 = arith.divf %331, %332 : vector<2x128xf32>
    %334 = math.tanh %328 : vector<2x128xf32>
    %335 = vector.extract_strided_slice %333 {offsets = [0, 0], sizes = [2, 32], strides = [1, 1]} : vector<2x128xf32> to vector<2x32xf32>
    %336 = vector.extract_strided_slice %333 {offsets = [0, 32], sizes = [2, 32], strides = [1, 1]} : vector<2x128xf32> to vector<2x32xf32>
    %337 = vector.extract_strided_slice %334 {offsets = [0, 64], sizes = [2, 32], strides = [1, 1]} : vector<2x128xf32> to vector<2x32xf32>
    %338 = vector.extract_strided_slice %333 {offsets = [0, 96], sizes = [2, 32], strides = [1, 1]} : vector<2x128xf32> to vector<2x32xf32>
    %339 = arith.mulf %336, %322 : vector<2x32xf32>
    %340 = arith.mulf %335, %337 : vector<2x32xf32>
    %341 = arith.addf %339, %340 : vector<2x32xf32>
    %342 = math.tanh %341 : vector<2x32xf32>
    %343 = arith.mulf %338, %342 : vector<2x32xf32>
    %344 = vector.extract_strided_slice %210 {offsets = [0, 0], sizes = [1, 32], strides = [1, 1]} : vector<2x32xf32> to vector<1x32xf32>
    %345 = vector.extract_strided_slice %229 {offsets = [0, 0], sizes = [1, 32], strides = [1, 1]} : vector<2x32xf32> to vector<1x32xf32>
    %346 = vector.extract_strided_slice %248 {offsets = [0, 0], sizes = [1, 32], strides = [1, 1]} : vector<2x32xf32> to vector<1x32xf32>
    %347 = vector.extract_strided_slice %267 {offsets = [0, 0], sizes = [1, 32], strides = [1, 1]} : vector<2x32xf32> to vector<1x32xf32>
    %348 = vector.extract_strided_slice %286 {offsets = [0, 0], sizes = [1, 32], strides = [1, 1]} : vector<2x32xf32> to vector<1x32xf32>
    %349 = vector.extract_strided_slice %305 {offsets = [0, 0], sizes = [1, 32], strides = [1, 1]} : vector<2x32xf32> to vector<1x32xf32>
    %350 = vector.extract_strided_slice %324 {offsets = [0, 0], sizes = [1, 32], strides = [1, 1]} : vector<2x32xf32> to vector<1x32xf32>
    %351 = vector.extract_strided_slice %343 {offsets = [0, 0], sizes = [1, 32], strides = [1, 1]} : vector<2x32xf32> to vector<1x32xf32>
    %352 = tpu.concatenate %344, %345, %346, %347, %348, %349, %350, %351 in 0 : vector<1x32xf32>, vector<1x32xf32>, vector<1x32xf32>, vector<1x32xf32>, vector<1x32xf32>, vector<1x32xf32>, vector<1x32xf32>, vector<1x32xf32> -> vector<8x32xf32>
    %353 = arith.truncf %352 : vector<8x32xf32> to vector<8x32xbf16>
    %cst_67 = arith.constant dense<0.000000e+00> : vector<8x32xf32>
    %354 = tpu.matmul %353, %9, %cst_67 {dimension_numbers = #tpu.dot_dimension_numbers<[1], [0], [0], [1], [0, 0, 1, 1], [], []>} : vector<8x32xbf16>, vector<32x32xbf16>, vector<8x32xf32> -> vector<8x32xf32>
    %355 = vector.broadcast %17 : vector<1x32xf32> to vector<8x32xf32>
    %356 = arith.addf %354, %355 : vector<8x32xf32>
    %c0_68 = arith.constant 0 : index
    %c0_69 = arith.constant 0 : index
    %c0_70 = arith.constant 0 : index
    %357 = vector.load %arg3[%c0_68, %c0_69, %c0_70] : memref<2x10x32xf32, #tpu.memory_space<vmem>>, vector<1x10x32xf32>
    %358 = vector.shape_cast %357 : vector<1x10x32xf32> to vector<10x32xf32>
    %359 = arith.truncf %358 : vector<10x32xf32> to vector<10x32xbf16>
    %cst_71 = arith.constant dense<0.000000e+00> : vector<10x64xf32>
    %360 = tpu.matmul %359, %7, %cst_71 {dimension_numbers = #tpu.dot_dimension_numbers<[1], [0], [0], [1], [0, 0, 1, 1], [], []>} : vector<10x32xbf16>, vector<32x64xbf16>, vector<10x64xf32> -> vector<10x64xf32>
    %361 = vector.broadcast %16 : vector<1x64xf32> to vector<10x64xf32>
    %362 = arith.addf %360, %361 : vector<10x64xf32>
    %c0_72 = arith.constant 0 : index
    %c0_73 = arith.constant 0 : index
    %363 = vector.load %arg4[%c0_72, %c0_73] : memref<2x10xf32, #tpu.memory_space<vmem>>, vector<1x10xf32>
    %cst_74 = arith.constant -1.000000e+09 : f32
    %364 = vector.broadcast %cst_74 : f32 to vector<1x10xf32>
    %365 = arith.mulf %363, %364 : vector<1x10xf32>
    %cst_75 = arith.constant 0.000000e+00 : f32
    %366 = vector.broadcast %cst_75 : f32 to vector<8x32xf32>
    %367 = vector.broadcast %18 : vector<1x32xf32> to vector<8x32xf32>
    %368 = arith.addf %366, %367 : vector<8x32xf32>
    %cst_76 = arith.constant 0.000000e+00 : f32
    %369 = vector.broadcast %cst_76 : f32 to vector<8x10xf32>
    %370 = vector.extract_strided_slice %356 {offsets = [0, 0], sizes = [8, 16], strides = [1, 1]} : vector<8x32xf32> to vector<8x16xf32>
    %371 = vector.extract_strided_slice %362 {offsets = [0, 0], sizes = [10, 16], strides = [1, 1]} : vector<10x64xf32> to vector<10x16xf32>
    %372 = arith.truncf %370 : vector<8x16xf32> to vector<8x16xbf16>
    %373 = arith.truncf %371 : vector<10x16xf32> to vector<10x16xbf16>
    %cst_77 = arith.constant dense<0.000000e+00> : vector<8x10xf32>
    %374 = tpu.matmul %372, %373, %cst_77 {dimension_numbers = #tpu.dot_dimension_numbers<[1], [1], [0], [0], [0, 0, 1, 0], [], []>} : vector<8x16xbf16>, vector<10x16xbf16>, vector<8x10xf32> -> vector<8x10xf32>
    %cst_78 = arith.constant 2.500000e-01 : f32
    %375 = vector.broadcast %cst_78 : f32 to vector<8x10xf32>
    %376 = arith.mulf %374, %375 : vector<8x10xf32>
    %377 = vector.broadcast %365 : vector<1x10xf32> to vector<8x10xf32>
    %378 = arith.addf %376, %377 : vector<8x10xf32>
    %cst_79 = arith.constant dense<0xFF800000> : vector<8xf32>
    %379 = vector.multi_reduction <maximumf>, %378, %cst_79 [1] : vector<8x10xf32> to vector<8xf32>
    %380 = vector.shape_cast %379 : vector<8xf32> to vector<8x1xf32>
    %381 = vector.broadcast %380 : vector<8x1xf32> to vector<8x10xf32>
    %382 = arith.subf %378, %381 : vector<8x10xf32>
    %383 = math.exp %382 : vector<8x10xf32>
    %cst_80 = arith.constant dense<0.000000e+00> : vector<8xf32>
    %384 = vector.multi_reduction <add>, %383, %cst_80 [1] : vector<8x10xf32> to vector<8xf32>
    %385 = vector.shape_cast %384 : vector<8xf32> to vector<8x1xf32>
    %386 = tpu.reciprocal %385 {approx = true} : vector<8x1xf32> -> vector<8x1xf32>
    %387 = vector.broadcast %386 : vector<8x1xf32> to vector<8x10xf32>
    %388 = arith.mulf %383, %387 : vector<8x10xf32>
    %389 = vector.extract_strided_slice %362 {offsets = [0, 32], sizes = [10, 16], strides = [1, 1]} : vector<10x64xf32> to vector<10x16xf32>
    %390 = vector.extract_strided_slice %11 {offsets = [0, 0], sizes = [16, 32], strides = [1, 1]} : vector<32x32xbf16> to vector<16x32xbf16>
    %391 = arith.truncf %389 : vector<10x16xf32> to vector<10x16xbf16>
    %cst_81 = arith.constant dense<0.000000e+00> : vector<10x32xf32>
    %392 = tpu.matmul %391, %390, %cst_81 {dimension_numbers = #tpu.dot_dimension_numbers<[1], [0], [0], [1], [0, 0, 1, 1], [], []>} : vector<10x16xbf16>, vector<16x32xbf16>, vector<10x32xf32> -> vector<10x32xf32>
    %393 = arith.truncf %388 : vector<8x10xf32> to vector<8x10xbf16>
    %394 = arith.truncf %392 : vector<10x32xf32> to vector<10x32xbf16>
    %cst_82 = arith.constant dense<0.000000e+00> : vector<8x32xf32>
    %395 = tpu.matmul %393, %394, %cst_82 {dimension_numbers = #tpu.dot_dimension_numbers<[1], [0], [0], [1], [0, 0, 1, 1], [], []>} : vector<8x10xbf16>, vector<10x32xbf16>, vector<8x32xf32> -> vector<8x32xf32>
    %396 = arith.addf %368, %395 : vector<8x32xf32>
    %397 = arith.addf %369, %388 : vector<8x10xf32>
    %398 = vector.extract_strided_slice %356 {offsets = [0, 16], sizes = [8, 16], strides = [1, 1]} : vector<8x32xf32> to vector<8x16xf32>
    %399 = vector.extract_strided_slice %362 {offsets = [0, 16], sizes = [10, 16], strides = [1, 1]} : vector<10x64xf32> to vector<10x16xf32>
    %400 = arith.truncf %398 : vector<8x16xf32> to vector<8x16xbf16>
    %401 = arith.truncf %399 : vector<10x16xf32> to vector<10x16xbf16>
    %cst_83 = arith.constant dense<0.000000e+00> : vector<8x10xf32>
    %402 = tpu.matmul %400, %401, %cst_83 {dimension_numbers = #tpu.dot_dimension_numbers<[1], [1], [0], [0], [0, 0, 1, 0], [], []>} : vector<8x16xbf16>, vector<10x16xbf16>, vector<8x10xf32> -> vector<8x10xf32>
    %cst_84 = arith.constant 2.500000e-01 : f32
    %403 = vector.broadcast %cst_84 : f32 to vector<8x10xf32>
    %404 = arith.mulf %402, %403 : vector<8x10xf32>
    %405 = vector.broadcast %365 : vector<1x10xf32> to vector<8x10xf32>
    %406 = arith.addf %404, %405 : vector<8x10xf32>
    %cst_85 = arith.constant dense<0xFF800000> : vector<8xf32>
    %407 = vector.multi_reduction <maximumf>, %406, %cst_85 [1] : vector<8x10xf32> to vector<8xf32>
    %408 = vector.shape_cast %407 : vector<8xf32> to vector<8x1xf32>
    %409 = vector.broadcast %408 : vector<8x1xf32> to vector<8x10xf32>
    %410 = arith.subf %406, %409 : vector<8x10xf32>
    %411 = math.exp %410 : vector<8x10xf32>
    %cst_86 = arith.constant dense<0.000000e+00> : vector<8xf32>
    %412 = vector.multi_reduction <add>, %411, %cst_86 [1] : vector<8x10xf32> to vector<8xf32>
    %413 = vector.shape_cast %412 : vector<8xf32> to vector<8x1xf32>
    %414 = tpu.reciprocal %413 {approx = true} : vector<8x1xf32> -> vector<8x1xf32>
    %415 = vector.broadcast %414 : vector<8x1xf32> to vector<8x10xf32>
    %416 = arith.mulf %411, %415 : vector<8x10xf32>
    %417 = vector.extract_strided_slice %362 {offsets = [0, 48], sizes = [10, 16], strides = [1, 1]} : vector<10x64xf32> to vector<10x16xf32>
    %418 = vector.extract_strided_slice %11 {offsets = [16, 0], sizes = [16, 32], strides = [1, 1]} : vector<32x32xbf16> to vector<16x32xbf16>
    %419 = arith.truncf %417 : vector<10x16xf32> to vector<10x16xbf16>
    %cst_87 = arith.constant dense<0.000000e+00> : vector<10x32xf32>
    %420 = tpu.matmul %419, %418, %cst_87 {dimension_numbers = #tpu.dot_dimension_numbers<[1], [0], [0], [1], [0, 0, 1, 1], [], []>} : vector<10x16xbf16>, vector<16x32xbf16>, vector<10x32xf32> -> vector<10x32xf32>
    %421 = arith.truncf %416 : vector<8x10xf32> to vector<8x10xbf16>
    %422 = arith.truncf %420 : vector<10x32xf32> to vector<10x32xbf16>
    %cst_88 = arith.constant dense<0.000000e+00> : vector<8x32xf32>
    %423 = tpu.matmul %421, %422, %cst_88 {dimension_numbers = #tpu.dot_dimension_numbers<[1], [0], [0], [1], [0, 0, 1, 1], [], []>} : vector<8x10xbf16>, vector<10x32xbf16>, vector<8x32xf32> -> vector<8x32xf32>
    %424 = arith.addf %396, %423 : vector<8x32xf32>
    %425 = arith.addf %397, %416 : vector<8x10xf32>
    %cst_89 = arith.constant 5.000000e-01 : f32
    %426 = vector.broadcast %cst_89 : f32 to vector<8x10xf32>
    %427 = arith.mulf %425, %426 : vector<8x10xf32>
    %c0_90 = arith.constant 0 : index
    %c0_91 = arith.constant 0 : index
    %c0_92 = arith.constant 0 : index
    %428 = vector.load %arg9[%c0_90, %c0_91, %c0_92] : memref<2x8x10xf32, #tpu.memory_space<vmem>>, vector<1x8x10xf32>
    %429 = vector.shape_cast %428 : vector<1x8x10xf32> to vector<8x10xf32>
    %430 = vector.shape_cast %427 : vector<8x10xf32> to vector<1x8x10xf32>
    tpu.vector_store %arg9[%c0_90, %c0_91, %c0_92], %430 {strides = array<i32>} : memref<2x8x10xf32, #tpu.memory_space<vmem>>, vector<1x8x10xf32>,
    %431 = arith.truncf %424 : vector<8x32xf32> to vector<8x32xbf16>
    %cst_93 = arith.constant dense<0.000000e+00> : vector<8x24xf32>
    %432 = tpu.matmul %431, %13, %cst_93 {dimension_numbers = #tpu.dot_dimension_numbers<[1], [0], [0], [1], [0, 0, 1, 1], [], []>} : vector<8x32xbf16>, vector<32x24xbf16>, vector<8x24xf32> -> vector<8x24xf32>
    %433 = vector.broadcast %19 : vector<1x24xf32> to vector<8x24xf32>
    %434 = arith.addf %432, %433 : vector<8x24xf32>
    %cst_94 = arith.constant dense<0xFF800000> : vector<8xf32>
    %435 = vector.multi_reduction <maximumf>, %434, %cst_94 [1] : vector<8x24xf32> to vector<8xf32>
    %436 = vector.shape_cast %435 : vector<8xf32> to vector<8x1xf32>
    %437 = vector.broadcast %436 : vector<8x1xf32> to vector<8x24xf32>
    %438 = arith.subf %434, %437 : vector<8x24xf32>
    %439 = math.exp %438 : vector<8x24xf32>
    %cst_95 = arith.constant dense<0.000000e+00> : vector<8xf32>
    %440 = vector.multi_reduction <add>, %439, %cst_95 [1] : vector<8x24xf32> to vector<8xf32>
    %441 = vector.shape_cast %440 : vector<8xf32> to vector<8x1xf32>
    %442 = math.log %441 : vector<8x1xf32>
    %443 = vector.broadcast %442 : vector<8x1xf32> to vector<8x24xf32>
    %444 = arith.subf %438, %443 : vector<8x24xf32>
    %c0_96 = arith.constant 0 : index
    %c0_97 = arith.constant 0 : index
    %c0_98 = arith.constant 0 : index
    %445 = vector.load %arg8[%c0_96, %c0_97, %c0_98] : memref<2x8x24xf32, #tpu.memory_space<vmem>>, vector<1x8x24xf32>
    %446 = vector.shape_cast %445 : vector<1x8x24xf32> to vector<8x24xf32>
    %447 = vector.shape_cast %444 : vector<8x24xf32> to vector<1x8x24xf32>
    tpu.vector_store %arg8[%c0_96, %c0_97, %c0_98], %447 {strides = array<i32>} : memref<2x8x24xf32, #tpu.memory_space<vmem>>, vector<1x8x24xf32>,
    %448 = vector.extract_strided_slice %210 {offsets = [1, 0], sizes = [1, 32], strides = [1, 1]} : vector<2x32xf32> to vector<1x32xf32>
    %449 = vector.extract_strided_slice %229 {offsets = [1, 0], sizes = [1, 32], strides = [1, 1]} : vector<2x32xf32> to vector<1x32xf32>
    %450 = vector.extract_strided_slice %248 {offsets = [1, 0], sizes = [1, 32], strides = [1, 1]} : vector<2x32xf32> to vector<1x32xf32>
    %451 = vector.extract_strided_slice %267 {offsets = [1, 0], sizes = [1, 32], strides = [1, 1]} : vector<2x32xf32> to vector<1x32xf32>
    %452 = vector.extract_strided_slice %286 {offsets = [1, 0], sizes = [1, 32], strides = [1, 1]} : vector<2x32xf32> to vector<1x32xf32>
    %453 = vector.extract_strided_slice %305 {offsets = [1, 0], sizes = [1, 32], strides = [1, 1]} : vector<2x32xf32> to vector<1x32xf32>
    %454 = vector.extract_strided_slice %324 {offsets = [1, 0], sizes = [1, 32], strides = [1, 1]} : vector<2x32xf32> to vector<1x32xf32>
    %455 = vector.extract_strided_slice %343 {offsets = [1, 0], sizes = [1, 32], strides = [1, 1]} : vector<2x32xf32> to vector<1x32xf32>
    %456 = tpu.concatenate %448, %449, %450, %451, %452, %453, %454, %455 in 0 : vector<1x32xf32>, vector<1x32xf32>, vector<1x32xf32>, vector<1x32xf32>, vector<1x32xf32>, vector<1x32xf32>, vector<1x32xf32>, vector<1x32xf32> -> vector<8x32xf32>
    %457 = arith.truncf %456 : vector<8x32xf32> to vector<8x32xbf16>
    %cst_99 = arith.constant dense<0.000000e+00> : vector<8x32xf32>
    %458 = tpu.matmul %457, %9, %cst_99 {dimension_numbers = #tpu.dot_dimension_numbers<[1], [0], [0], [1], [0, 0, 1, 1], [], []>} : vector<8x32xbf16>, vector<32x32xbf16>, vector<8x32xf32> -> vector<8x32xf32>
    %459 = vector.broadcast %17 : vector<1x32xf32> to vector<8x32xf32>
    %460 = arith.addf %458, %459 : vector<8x32xf32>
    %c1_100 = arith.constant 1 : index
    %c0_101 = arith.constant 0 : index
    %c0_102 = arith.constant 0 : index
    %461 = vector.load %arg3[%c1_100, %c0_101, %c0_102] : memref<2x10x32xf32, #tpu.memory_space<vmem>>, vector<1x10x32xf32>
    %462 = vector.shape_cast %461 : vector<1x10x32xf32> to vector<10x32xf32>
    %463 = arith.truncf %462 : vector<10x32xf32> to vector<10x32xbf16>
    %cst_103 = arith.constant dense<0.000000e+00> : vector<10x64xf32>
    %464 = tpu.matmul %463, %7, %cst_103 {dimension_numbers = #tpu.dot_dimension_numbers<[1], [0], [0], [1], [0, 0, 1, 1], [], []>} : vector<10x32xbf16>, vector<32x64xbf16>, vector<10x64xf32> -> vector<10x64xf32>
    %465 = vector.broadcast %16 : vector<1x64xf32> to vector<10x64xf32>
    %466 = arith.addf %464, %465 : vector<10x64xf32>
    %c1_104 = arith.constant 1 : index
    %c0_105 = arith.constant 0 : index
    %467 = vector.load %arg4[%c1_104, %c0_105] : memref<2x10xf32, #tpu.memory_space<vmem>>, vector<1x10xf32>
    %cst_106 = arith.constant -1.000000e+09 : f32
    %468 = vector.broadcast %cst_106 : f32 to vector<1x10xf32>
    %469 = arith.mulf %467, %468 : vector<1x10xf32>
    %cst_107 = arith.constant 0.000000e+00 : f32
    %470 = vector.broadcast %cst_107 : f32 to vector<8x32xf32>
    %471 = vector.broadcast %18 : vector<1x32xf32> to vector<8x32xf32>
    %472 = arith.addf %470, %471 : vector<8x32xf32>
    %cst_108 = arith.constant 0.000000e+00 : f32
    %473 = vector.broadcast %cst_108 : f32 to vector<8x10xf32>
    %474 = vector.extract_strided_slice %460 {offsets = [0, 0], sizes = [8, 16], strides = [1, 1]} : vector<8x32xf32> to vector<8x16xf32>
    %475 = vector.extract_strided_slice %466 {offsets = [0, 0], sizes = [10, 16], strides = [1, 1]} : vector<10x64xf32> to vector<10x16xf32>
    %476 = arith.truncf %474 : vector<8x16xf32> to vector<8x16xbf16>
    %477 = arith.truncf %475 : vector<10x16xf32> to vector<10x16xbf16>
    %cst_109 = arith.constant dense<0.000000e+00> : vector<8x10xf32>
    %478 = tpu.matmul %476, %477, %cst_109 {dimension_numbers = #tpu.dot_dimension_numbers<[1], [1], [0], [0], [0, 0, 1, 0], [], []>} : vector<8x16xbf16>, vector<10x16xbf16>, vector<8x10xf32> -> vector<8x10xf32>
    %cst_110 = arith.constant 2.500000e-01 : f32
    %479 = vector.broadcast %cst_110 : f32 to vector<8x10xf32>
    %480 = arith.mulf %478, %479 : vector<8x10xf32>
    %481 = vector.broadcast %469 : vector<1x10xf32> to vector<8x10xf32>
    %482 = arith.addf %480, %481 : vector<8x10xf32>
    %cst_111 = arith.constant dense<0xFF800000> : vector<8xf32>
    %483 = vector.multi_reduction <maximumf>, %482, %cst_111 [1] : vector<8x10xf32> to vector<8xf32>
    %484 = vector.shape_cast %483 : vector<8xf32> to vector<8x1xf32>
    %485 = vector.broadcast %484 : vector<8x1xf32> to vector<8x10xf32>
    %486 = arith.subf %482, %485 : vector<8x10xf32>
    %487 = math.exp %486 : vector<8x10xf32>
    %cst_112 = arith.constant dense<0.000000e+00> : vector<8xf32>
    %488 = vector.multi_reduction <add>, %487, %cst_112 [1] : vector<8x10xf32> to vector<8xf32>
    %489 = vector.shape_cast %488 : vector<8xf32> to vector<8x1xf32>
    %490 = tpu.reciprocal %489 {approx = true} : vector<8x1xf32> -> vector<8x1xf32>
    %491 = vector.broadcast %490 : vector<8x1xf32> to vector<8x10xf32>
    %492 = arith.mulf %487, %491 : vector<8x10xf32>
    %493 = vector.extract_strided_slice %466 {offsets = [0, 32], sizes = [10, 16], strides = [1, 1]} : vector<10x64xf32> to vector<10x16xf32>
    %494 = vector.extract_strided_slice %11 {offsets = [0, 0], sizes = [16, 32], strides = [1, 1]} : vector<32x32xbf16> to vector<16x32xbf16>
    %495 = arith.truncf %493 : vector<10x16xf32> to vector<10x16xbf16>
    %cst_113 = arith.constant dense<0.000000e+00> : vector<10x32xf32>
    %496 = tpu.matmul %495, %494, %cst_113 {dimension_numbers = #tpu.dot_dimension_numbers<[1], [0], [0], [1], [0, 0, 1, 1], [], []>} : vector<10x16xbf16>, vector<16x32xbf16>, vector<10x32xf32> -> vector<10x32xf32>
    %497 = arith.truncf %492 : vector<8x10xf32> to vector<8x10xbf16>
    %498 = arith.truncf %496 : vector<10x32xf32> to vector<10x32xbf16>
    %cst_114 = arith.constant dense<0.000000e+00> : vector<8x32xf32>
    %499 = tpu.matmul %497, %498, %cst_114 {dimension_numbers = #tpu.dot_dimension_numbers<[1], [0], [0], [1], [0, 0, 1, 1], [], []>} : vector<8x10xbf16>, vector<10x32xbf16>, vector<8x32xf32> -> vector<8x32xf32>
    %500 = arith.addf %472, %499 : vector<8x32xf32>
    %501 = arith.addf %473, %492 : vector<8x10xf32>
    %502 = vector.extract_strided_slice %460 {offsets = [0, 16], sizes = [8, 16], strides = [1, 1]} : vector<8x32xf32> to vector<8x16xf32>
    %503 = vector.extract_strided_slice %466 {offsets = [0, 16], sizes = [10, 16], strides = [1, 1]} : vector<10x64xf32> to vector<10x16xf32>
    %504 = arith.truncf %502 : vector<8x16xf32> to vector<8x16xbf16>
    %505 = arith.truncf %503 : vector<10x16xf32> to vector<10x16xbf16>
    %cst_115 = arith.constant dense<0.000000e+00> : vector<8x10xf32>
    %506 = tpu.matmul %504, %505, %cst_115 {dimension_numbers = #tpu.dot_dimension_numbers<[1], [1], [0], [0], [0, 0, 1, 0], [], []>} : vector<8x16xbf16>, vector<10x16xbf16>, vector<8x10xf32> -> vector<8x10xf32>
    %cst_116 = arith.constant 2.500000e-01 : f32
    %507 = vector.broadcast %cst_116 : f32 to vector<8x10xf32>
    %508 = arith.mulf %506, %507 : vector<8x10xf32>
    %509 = vector.broadcast %469 : vector<1x10xf32> to vector<8x10xf32>
    %510 = arith.addf %508, %509 : vector<8x10xf32>
    %cst_117 = arith.constant dense<0xFF800000> : vector<8xf32>
    %511 = vector.multi_reduction <maximumf>, %510, %cst_117 [1] : vector<8x10xf32> to vector<8xf32>
    %512 = vector.shape_cast %511 : vector<8xf32> to vector<8x1xf32>
    %513 = vector.broadcast %512 : vector<8x1xf32> to vector<8x10xf32>
    %514 = arith.subf %510, %513 : vector<8x10xf32>
    %515 = math.exp %514 : vector<8x10xf32>
    %cst_118 = arith.constant dense<0.000000e+00> : vector<8xf32>
    %516 = vector.multi_reduction <add>, %515, %cst_118 [1] : vector<8x10xf32> to vector<8xf32>
    %517 = vector.shape_cast %516 : vector<8xf32> to vector<8x1xf32>
    %518 = tpu.reciprocal %517 {approx = true} : vector<8x1xf32> -> vector<8x1xf32>
    %519 = vector.broadcast %518 : vector<8x1xf32> to vector<8x10xf32>
    %520 = arith.mulf %515, %519 : vector<8x10xf32>
    %521 = vector.extract_strided_slice %466 {offsets = [0, 48], sizes = [10, 16], strides = [1, 1]} : vector<10x64xf32> to vector<10x16xf32>
    %522 = vector.extract_strided_slice %11 {offsets = [16, 0], sizes = [16, 32], strides = [1, 1]} : vector<32x32xbf16> to vector<16x32xbf16>
    %523 = arith.truncf %521 : vector<10x16xf32> to vector<10x16xbf16>
    %cst_119 = arith.constant dense<0.000000e+00> : vector<10x32xf32>
    %524 = tpu.matmul %523, %522, %cst_119 {dimension_numbers = #tpu.dot_dimension_numbers<[1], [0], [0], [1], [0, 0, 1, 1], [], []>} : vector<10x16xbf16>, vector<16x32xbf16>, vector<10x32xf32> -> vector<10x32xf32>
    %525 = arith.truncf %520 : vector<8x10xf32> to vector<8x10xbf16>
    %526 = arith.truncf %524 : vector<10x32xf32> to vector<10x32xbf16>
    %cst_120 = arith.constant dense<0.000000e+00> : vector<8x32xf32>
    %527 = tpu.matmul %525, %526, %cst_120 {dimension_numbers = #tpu.dot_dimension_numbers<[1], [0], [0], [1], [0, 0, 1, 1], [], []>} : vector<8x10xbf16>, vector<10x32xbf16>, vector<8x32xf32> -> vector<8x32xf32>
    %528 = arith.addf %500, %527 : vector<8x32xf32>
    %529 = arith.addf %501, %520 : vector<8x10xf32>
    %cst_121 = arith.constant 5.000000e-01 : f32
    %530 = vector.broadcast %cst_121 : f32 to vector<8x10xf32>
    %531 = arith.mulf %529, %530 : vector<8x10xf32>
    %c1_122 = arith.constant 1 : index
    %c0_123 = arith.constant 0 : index
    %c0_124 = arith.constant 0 : index
    %532 = vector.load %arg9[%c1_122, %c0_123, %c0_124] : memref<2x8x10xf32, #tpu.memory_space<vmem>>, vector<1x8x10xf32>
    %533 = vector.shape_cast %532 : vector<1x8x10xf32> to vector<8x10xf32>
    %534 = vector.shape_cast %531 : vector<8x10xf32> to vector<1x8x10xf32>
    tpu.vector_store %arg9[%c1_122, %c0_123, %c0_124], %534 {strides = array<i32>} : memref<2x8x10xf32, #tpu.memory_space<vmem>>, vector<1x8x10xf32>,
    %535 = arith.truncf %528 : vector<8x32xf32> to vector<8x32xbf16>
    %cst_125 = arith.constant dense<0.000000e+00> : vector<8x24xf32>
    %536 = tpu.matmul %535, %13, %cst_125 {dimension_numbers = #tpu.dot_dimension_numbers<[1], [0], [0], [1], [0, 0, 1, 1], [], []>} : vector<8x32xbf16>, vector<32x24xbf16>, vector<8x24xf32> -> vector<8x24xf32>
    %537 = vector.broadcast %19 : vector<1x24xf32> to vector<8x24xf32>
    %538 = arith.addf %536, %537 : vector<8x24xf32>
    %cst_126 = arith.constant dense<0xFF800000> : vector<8xf32>
    %539 = vector.multi_reduction <maximumf>, %538, %cst_126 [1] : vector<8x24xf32> to vector<8xf32>
    %540 = vector.shape_cast %539 : vector<8xf32> to vector<8x1xf32>
    %541 = vector.broadcast %540 : vector<8x1xf32> to vector<8x24xf32>
    %542 = arith.subf %538, %541 : vector<8x24xf32>
    %543 = math.exp %542 : vector<8x24xf32>
    %cst_127 = arith.constant dense<0.000000e+00> : vector<8xf32>
    %544 = vector.multi_reduction <add>, %543, %cst_127 [1] : vector<8x24xf32> to vector<8xf32>
    %545 = vector.shape_cast %544 : vector<8xf32> to vector<8x1xf32>
    %546 = math.log %545 : vector<8x1xf32>
    %547 = vector.broadcast %546 : vector<8x1xf32> to vector<8x24xf32>
    %548 = arith.subf %542, %547 : vector<8x24xf32>
    %c1_128 = arith.constant 1 : index
    %c0_129 = arith.constant 0 : index
    %c0_130 = arith.constant 0 : index
    %549 = vector.load %arg8[%c1_128, %c0_129, %c0_130] : memref<2x8x24xf32, #tpu.memory_space<vmem>>, vector<1x8x24xf32>
    %550 = vector.shape_cast %549 : vector<1x8x24xf32> to vector<8x24xf32>
    %551 = vector.shape_cast %548 : vector<8x24xf32> to vector<1x8x24xf32>
    tpu.vector_store %arg8[%c1_128, %c0_129, %c0_130], %551 {strides = array<i32>} : memref<2x8x24xf32, #tpu.memory_space<vmem>>, vector<1x8x24xf32>,
    return
  }
}

</mosaic_0001>

<bundles_post_ra>
// kernel: decoder_forward.1
= control target key start
LH: loop header
LB: loop body
LE: loop exit
PB: predicated region body
PF: predicated region fallthrough
CT: control target
= control target key end

     0   :  { %15 = vsyncpa [#allocation3], 0  ;;  %s3871_s0 = inlined_call_operand.vmem [shape: f32[16,16], index: 0, kind: input, shape index: {}]   ;;  %s3872_s1 = inlined_call_operand.hbm [shape: f32[2,2,32], index: 1, kind: input, shape index: {}]   ;;  %s3873_s2 = inlined_call_operand.vmem [shape: f32[2,2,32], index: 2, kind: input, shape index: {}]   ;;  %s3874_s3 = inlined_call_operand.vmem [shape: f32[2,10,32], index: 3, kind: input, shape index: {}]   ;;  %s3875_s4 = inlined_call_operand.vmem [shape: f32[2,10], index: 4, kind: input, shape index: {}]   ;;  %s3876_s5 = inlined_call_operand.vmem [shape: f32[16,128], index: 5, kind: input, shape index: {}]   ;;  %s3877_s6 = inlined_call_operand.vmem [shape: f32[32,896], index: 6, kind: input, shape index: {}]   ;;  %s3878_s7 = inlined_call_operand.vmem [shape: f32[1,768], index: 7, kind: input, shape index: {}]   ;;  %s3879_s8 = inlined_call_operand.hbm [shape: f32[2,8,24], index: 8, kind: output, shape index: {0}]   ;;  %s3880_s9 = inlined_call_operand.hbm [shape: f32[2,8,10], index: 9, kind: output, shape index: {1}]  }
   0x1   :  { %16 = vsyncpa [#allocation4], 0 }
   0x2   :  { %17 = vsyncpa [#allocation7], 0  ;;  %s3201_s30 = smov [#allocation2]   ;;  %s3129_s13 = scalar_lea.hbm %s3872_s1, 64 }
   0x3   :  { %s25_s10 = sshll.u32 %s3201_s30, 4  ;;  %p3130_p0 = scmp.ne.s32.totalorder %s3872_s1, %s3129_s13  ;;  %s26_s10 = int_to_ptr.vmem [resolvable:$true] %s25_s10 }
   0x4   :  { %p3133_p1 = scmp.lt.u32.totalorder %s3129_s13, %s3872_s1 }
   0x6   :  { %p3135_p2 = pnand %p3133_p1, %p3130_p0 }
   0x8   :  { %3138 = shalt.err (!%p3135_p2)
}
   0x9   :  { %s3139_s18 = scalar_lea.vmem %s26_s10, 64  ;;  %p3144_p4 = scmp.lt.s32.totalorder %s26_s10, %s26_s10 }
   0xa   :  { %p3140_p3 = scmp.ne.s32.totalorder %s26_s10, %s3139_s18  ;;  %p3145_p5 = scmp.lt.s32.totalorder %s3139_s18, %s3139_s18 }
   0xc   :  { %p3146_p6 = por %p3145_p5, %p3144_p4 }
   0xe   :  { %p3147_p7 = pnand %p3146_p6, %p3140_p3 }
  0x10   :  { %3150 = shalt.err (!%p3147_p7)
}
  0x11   :  { %s3202_s19 = smov 32   ;;  %s3203_s20 = smov 2  }
  0x12   :  { %31 = dma.hbm_to_vmem [thread:$0]  %s3872_s1, 64, %s26_s10, [#allocation3], %s3202_s19, %s3202_s19, %s3203_s20  }
  0x13   :  { %3195 = dma.done.wait [#allocation3], 64  }
  0x14   :  { %3196 = vsyncadd [#allocation3], 4294967232  ;;  %v3204_v0 = vmov 0.0   ;;  %vm3205_vm0 = vmmov 0   ;;  %v98_v1 = vld [vmem:[%s3876_s5] sm:$0xff]  ;;  %v99_v2 = vld [vmem:[%s3876_s5 + $0x8] sm:$0xff] }
  0x15   :  { %2692 = vmatprep.subr.bf16.mxu0 %v3204_v0  ;;  %2698 = vmatprep.subr.bf16.mxu1 %v3204_v0  ;;  %v48_v3 = vld [vmem:[%s3877_s6] sm:$0xff]  ;;  %v101_v4 = vpack.c.bf16 %v99_v2, %v98_v1  ;;  %v49_v5 = vld [vmem:[%s3877_s6 + $0x38] sm:$0xff]  ;;  %v97_v7 = vld [vmem:[%s3871_s0 + $0x8] sm:$0xff]  ;;  %vm108_vm1 = vcmask 130048   ;;  %vm156_vm2 = vcmask 261120   ;;  %s3206_s17 = smov 64  }
  0x16   :  { %2694 = vmatprep.mubr.msk.bf16.mxu0 %vm3205_vm0, %v3204_v0  ;;  %2702 = vmatprep.mubr.msk.bf16.mxu1 %vm3205_vm0, %v3204_v0  ;;  %v96_v6 = vld [vmem:[%s3871_s0] sm:$0xff]  ;;  %v3302_v8 = vpack.c.bf16 %v49_v5, %v48_v3  ;;  %v50_v10 = vld [vmem:[%s3877_s6 + $0x70] sm:$0xff]  ;;  %v51_v11 = vld [vmem:[%s3877_s6 + $0xa8] sm:$0xff]  ;;  %vm777_vm3 = vcmask 1041408   ;;  %vm779_vm4 = vcmask 1043456   ;;  %vm781_vm5 = vcmask 1045504  }
  0x17   :  { %v100_v9 = vpack.c.bf16 %v97_v7, %v96_v6  ;;  %2693 = vmatpush3.bf16.msra.mxu0 %v101_v4  ;;  %v3311_v12 = vpack.c.bf16 %v51_v11, %v50_v10  ;;  %v153_v13 = vld [vmem:[#allocation2] sm:$0x3]  ;;  %vm1486_vm6 = vcmask 1040384   ;;  %vm1489_vm7 = vcmask 1042432   ;;  %s3208_s0 = smov 112   ;;  %s3209_s1 = smov 80  }
  0x18   :  { %2699 = vmatpush3.bf16.msra.mxu1 %v3302_v8  ;;  %2706 = vmatprep.subr.bf16.mxu0 %v3204_v0  ;;  %v155_v14 = vpack.c.bf16 %v153_v13, %v153_v13  ;;  %v2536_v15 = vld [vmem:[%s3878_s7] ss:$0 sm:$0xff]  ;;  %vm1492_vm8 = vcmask 1044480   ;;  %vm1495_vm9 = vcmask 1046528   ;;  %vm1666_vm10 = vcmask 80896  }
  0x19   :  { %2700 = vmatprep.subr.bf16.mxu1 %v3204_v0  ;;  %v154_v28 = vld [vmem:[%s3873_s2] sm:$0x3]  ;;  %vm1987_vm11 = vcmask 195584  }
  0x1a   :  { %2695 = vmatmul.mubr.msk.bf16.vlgmr.msra.gmra.mrb[0].mxu0 %vm108_vm1, %v100_v9 }
  0x1b   :  { %2707 = vmatpush3.bf16.msra.mxu0 %v3302_v8  ;;  %2710 = vmatprep.mubr.msk.bf16.mxu0 %vm3205_vm0, %v3204_v0 }
  0x1c   :  { %2701 = vmatpush3.bf16.msra.mxu1 %v3311_v12  ;;  %2708 = vmatprep.subr.bf16.mxu0 %v3204_v0 }
  0x1d   :  { %2714 = vmatprep.subr.bf16.mxu1 %v3204_v0 }
  0x1f   :  { %2703 = vmatmul.mubr.msk.bf16.vlgmr.msra.gmra.mrb[0].mxu1 %vm156_vm2, %v155_v14  ;;  %2709 = vmatpush3.bf16.msra.mxu0 %v3311_v12 }
  0x20   :  { %2715 = vmatpush3.bf16.msra.mxu1 %v3302_v8  ;;  %2718 = vmatprep.mubr.msk.bf16.mxu1 %vm3205_vm0, %v3204_v0 }
  0x21   :  { %2716 = vmatprep.subr.bf16.mxu1 %v3204_v0  ;;  %2722 = vmatprep.subr.bf16.mxu0 %v3204_v0 }
  0x24   :  { %2717 = vmatpush3.bf16.msra.mxu1 %v3311_v12 }
  0x25   :  { %2730 = vmatprep.subr.bf16.mxu1 %v3204_v0 }
  0xed   :  { %v146_v16 = vpop.f32.mrb[0].mxu0 }
  0xee   :  { %v2696_v17 = vpop.f32.mrb[1].mxu0  ;;  %v3334_v18 = vadd.f32 %v2536_v15, %v146_v16 }
  0xef   :  { %v149_v19 = vpop.f32.mrb[2].mxu0 }
  0xf0   :  { %v3336_v20 = vadd.f32 %v2536_v15, %v149_v19  ;;  %v2697_v21 = vpop.f32.mrb[3].mxu0 }
  0xf2   :  { %v194_v22 = vpop.f32.mrb[0].mxu1 }
  0xf3   :  { %v200_v23 = vadd.f32 %v194_v22, %v3334_v18  ;;  %v2704_v24 = vpop.f32.mrb[1].mxu1 }
  0xf4   :  { %v197_v25 = vpop.f32.mrb[2].mxu1 }
  0xf5   :  { %2977 = vtanh.f32 %v200_v23  ;;  %v2705_v26 = vpop.f32.mrb[3].mxu1  ;;  %v2539_v29 = vmul.f32 -1.442695, %v200_v23 }
  0xf7   :  { %2979 = vpow2.f32 %v2539_v29 }
  0xff   :  { %v2978_v27 = vpop.eup %2977 }
 0x100   :  { %214 = vrot.lane.b32.xlu0 %v2978_v27, %s3206_s17 }
 0x101   :  { %v2980_v30 = vpop.eup %2979 }
 0x102   :  { %v204_v31 = vadd.f32 1.0, %v2980_v30 }
 0x104   :  { %209 = vrot.lane.b32.xlu0 %v154_v28, %s3202_s19  ;;  %2981 = vrcp.f32 %v204_v31 }
 0x10e   :  { %v2982_v32 = vpop.eup %2981 }
 0x172   :  { %v215_v33 = vpop.permute.xlu0 %214 }
 0x173   :  { %v217_v34 = vmul.f32 %v2982_v32, %v215_v33 }
 0x175   :  { %219 = vrot.lane.b32.xlu1 %v217_v34, %s3202_s19 }
 0x176   :  { %v210_v35 = vpop.permute.xlu0 %209 }
 0x177   :  { %v212_v36 = vmul.f32 %v2982_v32, %v210_v35 }
 0x1e7   :  { %v220_v37 = vpop.permute.xlu1 %219 }
 0x1e8   :  { %v222_v38 = vadd.f32 %v220_v37, %v212_v36 }
 0x1ea   :  { %2983 = vtanh.f32 %v222_v38  ;;  %v288_v57 = vrot.slane %v222_v38, 6 }
 0x1f4   :  { %v2984_v39 = vpop.eup %2983 }
 0x1f5   :  { %225 = vrot.lane.b32.xlu1 %v2984_v39, %s3206_s17 }
 0x267   :  { %v226_v40 = vpop.permute.xlu1 %225 }
 0x268   :  { %v3346_v41 = vmul.f32 %v2982_v32, %v226_v40 }
 0x26a   :  { %v229_v42 = vpack.c.bf16 %v3346_v41, %v3346_v41 }
 0x26c   :  { %231 = vrot.lane.b32.xlu0 %v229_v42, %s3202_s19 }
 0x2de   :  { %v232_v43 = vpop.permute.xlu0 %231 }
 0x2df   :  { %2711 = vmatmul.mubr.msk.bf16.vlgmr.msra.gmra.mrb[4].mxu0 %vm156_vm2, %v232_v43 }
 0x2e0   :  { %2723 = vmatpush3.bf16.msra.mxu0 %v3302_v8  ;;  %2726 = vmatprep.mubr.msk.bf16.mxu0 %vm3205_vm0, %v3204_v0 }
 0x2e1   :  { %2724 = vmatprep.subr.bf16.mxu0 %v3204_v0 }
 0x2e4   :  { %2725 = vmatpush3.bf16.msra.mxu0 %v3311_v12 }
 0x2e5   :  { %2738 = vmatprep.subr.bf16.mxu0 %v3204_v0 }
 0x3b2   :  { %v270_v44 = vpop.f32.mrb[4].mxu0 }
 0x3b3   :  { %v277_v45 = vrot.slane %v270_v44, 6  ;;  %v2712_v46 = vpop.f32.mrb[5].mxu0 }
 0x3b4   :  { %v273_v47 = vpop.f32.mrb[6].mxu0 }
 0x3b5   :  { %v279_v48 = vadd.f32 %v277_v45, %v3334_v18  ;;  %v2713_v49 = vpop.f32.mrb[7].mxu0 }
 0x3b7   :  { %2985 = vtanh.f32 %v279_v48  ;;  %v2541_v51 = vmul.f32 -1.442695, %v279_v48 }
 0x3b9   :  { %2987 = vpow2.f32 %v2541_v51 }
 0x3c1   :  { %v2986_v50 = vpop.eup %2985 }
 0x3c2   :  { %292 = vrot.lane.b32.xlu1 %v2986_v50, %s3206_s17 }
 0x3c3   :  { %v2988_v52 = vpop.eup %2987 }
 0x3c4   :  { %v283_v53 = vadd.f32 1.0, %v2988_v52 }
 0x3c6   :  { %2989 = vrcp.f32 %v283_v53 }
 0x3d0   :  { %v2990_v54 = vpop.eup %2989 }
 0x3d1   :  { %v290_v58 = vmul.f32 %v2990_v54, %v288_v57 }
 0x434   :  { %v293_v55 = vpop.permute.xlu1 %292 }
 0x435   :  { %v295_v56 = vmul.f32 %v2990_v54, %v293_v55 }
 0x437   :  { %297 = vrot.lane.b32.xlu0 %v295_v56, %s3202_s19 }
 0x4a9   :  { %v298_v59 = vpop.permute.xlu0 %297 }
 0x4aa   :  { %v300_v60 = vadd.f32 %v298_v59, %v290_v58 }
 0x4ac   :  { %2991 = vtanh.f32 %v300_v60  ;;  %v367_v21 = vrot.slane %v300_v60, 6 }
 0x4b6   :  { %v2992_v61 = vpop.eup %2991 }
 0x4b7   :  { %303 = vrot.lane.b32.xlu1 %v2992_v61, %s3206_s17 }
 0x529   :  { %v304_v62 = vpop.permute.xlu1 %303 }
 0x52a   :  { %v306_v63 = vmul.f32 %v2990_v54, %v304_v62 }
 0x52c   :  { %v307_v1 = vpack.c.bf16 %v306_v63, %v306_v63  ;;  %v778_v28 = vsel %vm777_vm3, %v3346_v41, %v306_v63 }
 0x52e   :  { %v309_v2 = vrot.slane %v307_v1, 1 }
 0x530   :  { %310 = vrot.lane.b32.xlu0 %v309_v2, %s3202_s19 }
 0x5a2   :  { %v311_v3 = vpop.permute.xlu0 %310 }
 0x5a3   :  { %2719 = vmatmul.mubr.msk.bf16.vlgmr.msra.gmra.mrb[4].mxu1 %vm156_vm2, %v311_v3 }
 0x5a4   :  { %2731 = vmatpush3.bf16.msra.mxu1 %v3302_v8  ;;  %2734 = vmatprep.mubr.msk.bf16.mxu1 %vm3205_vm0, %v3204_v0 }
 0x5a5   :  { %2732 = vmatprep.subr.bf16.mxu1 %v3204_v0 }
 0x5a8   :  { %2733 = vmatpush3.bf16.msra.mxu1 %v3311_v12 }
 0x5a9   :  { %2746 = vmatprep.subr.bf16.mxu1 %v3204_v0 }
 0x676   :  { %v349_v4 = vpop.f32.mrb[4].mxu1 }
 0x677   :  { %v356_v5 = vrot.slane %v349_v4, 4  ;;  %v2720_v6 = vpop.f32.mrb[5].mxu1 }
 0x678   :  { %v352_v7 = vpop.f32.mrb[6].mxu1 }
 0x679   :  { %v358_v9 = vadd.f32 %v356_v5, %v3334_v18  ;;  %v2721_v10 = vpop.f32.mrb[7].mxu1 }
 0x67b   :  { %2993 = vtanh.f32 %v358_v9  ;;  %v2543_v13 = vmul.f32 -1.442695, %v358_v9 }
 0x67d   :  { %2995 = vpow2.f32 %v2543_v13 }
 0x685   :  { %v2994_v11 = vpop.eup %2993 }
 0x686   :  { %371 = vrot.lane.b32.xlu1 %v2994_v11, %s3206_s17 }
 0x687   :  { %v2996_v14 = vpop.eup %2995 }
 0x688   :  { %v362_v15 = vadd.f32 1.0, %v2996_v14 }
 0x68a   :  { %2997 = vrcp.f32 %v362_v15 }
 0x694   :  { %v2998_v16 = vpop.eup %2997 }
 0x695   :  { %v369_v22 = vmul.f32 %v2998_v16, %v367_v21 }
 0x6f8   :  { %v372_v17 = vpop.permute.xlu1 %371 }
 0x6f9   :  { %v374_v19 = vmul.f32 %v2998_v16, %v372_v17 }
 0x6fb   :  { %376 = vrot.lane.b32.xlu0 %v374_v19, %s3202_s19 }
 0x76d   :  { %v377_v23 = vpop.permute.xlu0 %376 }
 0x76e   :  { %v379_v24 = vadd.f32 %v377_v23, %v369_v22 }
 0x770   :  { %2999 = vtanh.f32 %v379_v24  ;;  %v446_v46 = vrot.slane %v379_v24, 6 }
 0x77a   :  { %v3000_v25 = vpop.eup %2999 }
 0x77b   :  { %382 = vrot.lane.b32.xlu1 %v3000_v25, %s3206_s17 }
 0x7ed   :  { %v383_v26 = vpop.permute.xlu1 %382 }
 0x7ee   :  { %v385_v27 = vmul.f32 %v2998_v16, %v383_v26 }
 0x7f0   :  { %v386_v29 = vpack.c.bf16 %v385_v27, %v385_v27  ;;  %v780_v30 = vsel %vm779_vm4, %v778_v28, %v385_v27 }
 0x7f2   :  { %v388_v31 = vrot.slane %v386_v29, 2 }
 0x7f4   :  { %389 = vrot.lane.b32.xlu0 %v388_v31, %s3202_s19 }
 0x866   :  { %v390_v32 = vpop.permute.xlu0 %389 }
 0x867   :  { %2727 = vmatmul.mubr.msk.bf16.vlgmr.msra.gmra.mrb[8].mxu0 %vm156_vm2, %v390_v32 }
 0x868   :  { %2739 = vmatpush3.bf16.msra.mxu0 %v3302_v8  ;;  %2742 = vmatprep.mubr.msk.bf16.mxu0 %vm3205_vm0, %v3204_v0 }
 0x869   :  { %2740 = vmatprep.subr.bf16.mxu0 %v3204_v0 }
 0x86c   :  { %2741 = vmatpush3.bf16.msra.mxu0 %v3311_v12 }
 0x86d   :  { %2754 = vmatprep.subr.bf16.mxu0 %v3204_v0 }
 0x93a   :  { %v428_v33 = vpop.f32.mrb[8].mxu0 }
 0x93b   :  { %v435_v34 = vrot.slane %v428_v33, 2  ;;  %v2728_v35 = vpop.f32.mrb[9].mxu0 }
 0x93c   :  { %v431_v36 = vpop.f32.mrb[10].mxu0 }
 0x93d   :  { %v437_v37 = vadd.f32 %v435_v34, %v3334_v18  ;;  %v2729_v38 = vpop.f32.mrb[11].mxu0 }
 0x93f   :  { %3001 = vtanh.f32 %v437_v37  ;;  %v2545_v40 = vmul.f32 -1.442695, %v437_v37 }
 0x941   :  { %3003 = vpow2.f32 %v2545_v40 }
 0x949   :  { %v3002_v39 = vpop.eup %3001 }
 0x94a   :  { %450 = vrot.lane.b32.xlu1 %v3002_v39, %s3206_s17 }
 0x94b   :  { %v3004_v41 = vpop.eup %3003 }
 0x94c   :  { %v441_v42 = vadd.f32 1.0, %v3004_v41 }
 0x94e   :  { %3005 = vrcp.f32 %v441_v42 }
 0x958   :  { %v3006_v43 = vpop.eup %3005 }
 0x959   :  { %v448_v47 = vmul.f32 %v3006_v43, %v446_v46 }
 0x9bc   :  { %v451_v44 = vpop.permute.xlu1 %450 }
 0x9bd   :  { %v453_v45 = vmul.f32 %v3006_v43, %v451_v44 }
 0x9bf   :  { %455 = vrot.lane.b32.xlu0 %v453_v45, %s3202_s19 }
 0xa31   :  { %v456_v48 = vpop.permute.xlu0 %455 }
 0xa32   :  { %v458_v49 = vadd.f32 %v456_v48, %v448_v47 }
 0xa34   :  { %3007 = vtanh.f32 %v458_v49  ;;  %v522_v5 = vrot.slane %v458_v49, 6 }
 0xa3e   :  { %v3008_v18 = vpop.eup %3007 }
 0xa3f   :  { %461 = vrot.lane.b32.xlu1 %v3008_v18, %s3206_s17 }
 0xab1   :  { %v462_v50 = vpop.permute.xlu1 %461 }
 0xab2   :  { %v464_v51 = vmul.f32 %v3006_v43, %v462_v50 }
 0xab4   :  { %v465_v52 = vpack.c.bf16 %v464_v51, %v464_v51  ;;  %v3390_v53 = vsel %vm781_vm5, %v780_v30, %v464_v51 }
 0xab6   :  { %v467_v54 = vrot.slane %v465_v52, 3 }
 0xab8   :  { %468 = vrot.lane.b32.xlu0 %v467_v54, %s3202_s19 }
 0xb2a   :  { %v469_v55 = vpop.permute.xlu0 %468 }
 0xb2b   :  { %2735 = vmatmul.mubr.msk.bf16.vlgmr.msra.gmra.mrb[8].mxu1 %vm156_vm2, %v469_v55 }
 0xb2c   :  { %2747 = vmatpush3.bf16.msra.mxu1 %v3302_v8  ;;  %2750 = vmatprep.mubr.msk.bf16.mxu1 %vm3205_vm0, %v3204_v0 }
 0xb2d   :  { %2748 = vmatprep.subr.bf16.mxu1 %v3204_v0 }
 0xb30   :  { %2749 = vmatpush3.bf16.msra.mxu1 %v3311_v12 }
 0xb31   :  { %2762 = vmatprep.subr.bf16.mxu1 %v3204_v0 }
 0xbfe   :  { %v507_v56 = vpop.f32.mrb[8].mxu1 }
 0xbff   :  { %v513_v57 = vadd.f32 %v507_v56, %v3336_v20  ;;  %v2736_v58 = vpop.f32.mrb[9].mxu1 }
 0xc00   :  { %v510_v59 = vpop.f32.mrb[10].mxu1 }
 0xc01   :  { %3009 = vtanh.f32 %v513_v57  ;;  %v2737_v60 = vpop.f32.mrb[11].mxu1  ;;  %v2547_v62 = vmul.f32 -1.442695, %v513_v57 }
 0xc03   :  { %3011 = vpow2.f32 %v2547_v62 }
 0xc0b   :  { %v3010_v61 = vpop.eup %3009 }
 0xc0c   :  { %526 = vrot.lane.b32.xlu1 %v3010_v61, %s3206_s17 }
 0xc0d   :  { %v3012_v63 = vpop.eup %3011 }
 0xc0e   :  { %v517_v1 = vadd.f32 1.0, %v3012_v63 }
 0xc10   :  { %3013 = vrcp.f32 %v517_v1 }
 0xc1a   :  { %v3014_v2 = vpop.eup %3013 }
 0xc1b   :  { %v524_v6 = vmul.f32 %v3014_v2, %v522_v5 }
 0xc7e   :  { %v527_v3 = vpop.permute.xlu1 %526 }
 0xc7f   :  { %v529_v4 = vmul.f32 %v3014_v2, %v527_v3 }
 0xc81   :  { %531 = vrot.lane.b32.xlu0 %v529_v4, %s3202_s19 }
 0xcf3   :  { %v532_v7 = vpop.permute.xlu0 %531 }
 0xcf4   :  { %v534_v9 = vadd.f32 %v532_v7, %v524_v6 }
 0xcf6   :  { %3015 = vtanh.f32 %v534_v9  ;;  %v600_v29 = vrot.slane %v534_v9, 6 }
 0xd00   :  { %v3016_v10 = vpop.eup %3015 }
 0xd01   :  { %537 = vrot.lane.b32.xlu1 %v3016_v10, %s3206_s17 }
 0xd73   :  { %v538_v11 = vpop.permute.xlu1 %537 }
 0xd74   :  { %v3404_v13 = vmul.f32 %v3014_v2, %v538_v11 }
 0xd76   :  { %v541_v14 = vpack.c.bf16 %v3404_v13, %v3404_v13 }
 0xd78   :  { %543 = vrot.lane.b32.xlu0 %v541_v14, %s3202_s19 }
 0xdea   :  { %v544_v15 = vpop.permute.xlu0 %543 }
 0xdeb   :  { %2743 = vmatmul.mubr.msk.bf16.vlgmr.msra.gmra.mrb[12].mxu0 %vm156_vm2, %v544_v15 }
 0xdec   :  { %2755 = vmatpush3.bf16.msra.mxu0 %v3302_v8  ;;  %2758 = vmatprep.mubr.msk.bf16.mxu0 %vm3205_vm0, %v3204_v0 }
 0xded   :  { %2756 = vmatprep.subr.bf16.mxu0 %v3204_v0 }
 0xdf0   :  { %2757 = vmatpush3.bf16.msra.mxu0 %v3311_v12 }
 0xdf1   :  { %2770 = vmatprep.subr.bf16.mxu0 %v3204_v0 }
 0xebe   :  { %v582_v16 = vpop.f32.mrb[12].mxu0 }
 0xebf   :  { %v589_v17 = vrot.slane %v582_v16, 6  ;;  %v2744_v19 = vpop.f32.mrb[13].mxu0 }
 0xec0   :  { %v585_v21 = vpop.f32.mrb[14].mxu0 }
 0xec1   :  { %v591_v22 = vadd.f32 %v589_v17, %v3336_v20  ;;  %v2745_v23 = vpop.f32.mrb[15].mxu0 }
 0xec2   :  { %v54_v23 = vld [vmem:[%s3877_s6 + $0x8] sm:$0xff] }
 0xec3   :  { %3017 = vtanh.f32 %v591_v22  ;;  %v2549_v8 = vmul.f32 -1.442695, %v591_v22  ;;  %v61_v22 = vld [vmem:[%s3877_s6 + $0x48] sm:$0xff] }
 0xec5   :  { %3019 = vpow2.f32 %v2549_v8  ;;  %v55_v8 = vld [vmem:[%s3877_s6 + $0x40] sm:$0xff] }
 0xecd   :  { %v3018_v24 = vpop.eup %3017 }
 0xece   :  { %604 = vrot.lane.b32.xlu1 %v3018_v24, %s3206_s17 }
 0xecf   :  { %v3020_v25 = vpop.eup %3019 }
 0xed0   :  { %v595_v26 = vadd.f32 1.0, %v3020_v25  ;;  %v62_v25 = vld [vmem:[%s3877_s6 + $0x80] sm:$0xff] }
 0xed2   :  { %3021 = vrcp.f32 %v595_v26  ;;  %v63_v26 = vld [vmem:[%s3877_s6 + $0xb8] sm:$0xff] }
 0xedc   :  { %v3022_v27 = vpop.eup %3021 }
 0xedd   :  { %v602_v30 = vmul.f32 %v3022_v27, %v600_v29  ;;  %v3465_v29 = vpack.c.bf16 %v63_v26, %v62_v25 }
 0xf40   :  { %v605_v12 = vpop.permute.xlu1 %604 }
 0xf41   :  { %v607_v28 = vmul.f32 %v3022_v27, %v605_v12  ;;  %v56_v12 = vld [vmem:[%s3877_s6 + $0x78] sm:$0xff] }
 0xf43   :  { %609 = vrot.lane.b32.xlu0 %v607_v28, %s3202_s19  ;;  %v57_v28 = vld [vmem:[%s3877_s6 + $0xb0] sm:$0xff] }
 0xfb5   :  { %v610_v31 = vpop.permute.xlu0 %609 }
 0xfb6   :  { %v612_v32 = vadd.f32 %v610_v31, %v602_v30  ;;  %v841_v30 = vld [vmem:[#allocation2 + $0x2] sm:$0x3]  ;;  %v59_v31 = vpack.c.bf16 %v57_v28, %v56_v12 }
 0xfb8   :  { %3023 = vtanh.f32 %v612_v32  ;;  %v679_v51 = vrot.slane %v612_v32, 6  ;;  %v844_v32 = vpack.c.bf16 %v841_v30, %v841_v30 }
 0xfc2   :  { %v3024_v33 = vpop.eup %3023 }
 0xfc3   :  { %615 = vrot.lane.b32.xlu1 %v3024_v33, %s3206_s17 }
0x1035   :  { %v616_v34 = vpop.permute.xlu1 %615 }
0x1036   :  { %v618_v35 = vmul.f32 %v3022_v27, %v616_v34  ;;  %v58_v27 = vpack.c.bf16 %v55_v8, %v54_v23 }
0x1038   :  { %v619_v36 = vpack.c.bf16 %v618_v35, %v618_v35  ;;  %v783_v59 = vsel %vm777_vm3, %v3404_v13, %v618_v35 }
0x103a   :  { %v621_v37 = vrot.slane %v619_v36, 1 }
0x103c   :  { %622 = vrot.lane.b32.xlu0 %v621_v37, %s3202_s19 }
0x10ae   :  { %v623_v38 = vpop.permute.xlu0 %622 }
0x10af   :  { %2751 = vmatmul.mubr.msk.bf16.vlgmr.msra.gmra.mrb[12].mxu1 %vm156_vm2, %v623_v38  ;;  %v2556_v38 = vld [vmem:[%s3873_s2 + $0x2] sm:$0x3]  ;;  %s3207_s2 = smov 96  }
0x10b0   :  { %2766 = vmatprep.mubr.msk.bf16.mxu1 %vm3205_vm0, %v3204_v0  ;;  %2763 = vmatpush3.bf16.msra.mxu1 %v58_v27 }
0x10b1   :  { %2764 = vmatprep.subr.bf16.mxu1 %v3204_v0 }
0x10b4   :  { %2765 = vmatpush3.bf16.msra.mxu1 %v59_v31 }
0x10b5   :  { %2778 = vmatprep.subr.bf16.mxu1 %v3204_v0 }
0x1182   :  { %v661_v39 = vpop.f32.mrb[12].mxu1 }
0x1183   :  { %v668_v40 = vrot.slane %v661_v39, 4  ;;  %v2752_v41 = vpop.f32.mrb[13].mxu1 }
0x1184   :  { %v664_v42 = vpop.f32.mrb[14].mxu1 }
0x1185   :  { %v670_v43 = vadd.f32 %v668_v40, %v3336_v20  ;;  %v2753_v44 = vpop.f32.mrb[15].mxu1 }
0x1187   :  { %3025 = vtanh.f32 %v670_v43  ;;  %v2551_v46 = vmul.f32 -1.442695, %v670_v43 }
0x1189   :  { %3027 = vpow2.f32 %v2551_v46 }
0x1191   :  { %v3026_v45 = vpop.eup %3025 }
0x1192   :  { %683 = vrot.lane.b32.xlu1 %v3026_v45, %s3206_s17 }
0x1193   :  { %v3028_v47 = vpop.eup %3027 }
0x1194   :  { %v674_v48 = vadd.f32 1.0, %v3028_v47 }
0x1196   :  { %3029 = vrcp.f32 %v674_v48 }
0x11a0   :  { %v3030_v49 = vpop.eup %3029 }
0x11a1   :  { %v681_v52 = vmul.f32 %v3030_v49, %v679_v51 }
0x1204   :  { %v684_v18 = vpop.permute.xlu1 %683 }
0x1205   :  { %v686_v50 = vmul.f32 %v3030_v49, %v684_v18 }
0x1207   :  { %688 = vrot.lane.b32.xlu0 %v686_v50, %s3202_s19 }
0x1279   :  { %v689_v54 = vpop.permute.xlu0 %688 }
0x127a   :  { %v691_v55 = vadd.f32 %v689_v54, %v681_v52 }
0x127c   :  { %3031 = vtanh.f32 %v691_v55  ;;  %v758_v16 = vrot.slane %v691_v55, 6 }
0x1286   :  { %v3032_v56 = vpop.eup %3031 }
0x1287   :  { %694 = vrot.lane.b32.xlu1 %v3032_v56, %s3206_s17 }
0x12f9   :  { %v695_v57 = vpop.permute.xlu1 %694 }
0x12fa   :  { %v697_v58 = vmul.f32 %v3030_v49, %v695_v57 }
0x12fc   :  { %v698_v60 = vpack.c.bf16 %v697_v58, %v697_v58  ;;  %v784_v61 = vsel %vm779_vm4, %v783_v59, %v697_v58 }
0x12fe   :  { %v700_v62 = vrot.slane %v698_v60, 2 }
0x1300   :  { %701 = vrot.lane.b32.xlu0 %v700_v62, %s3202_s19 }
0x1372   :  { %v702_v63 = vpop.permute.xlu0 %701 }
0x1373   :  { %2759 = vmatmul.mubr.msk.bf16.vlgmr.msra.gmra.mrb[16].mxu0 %vm156_vm2, %v702_v63 }
0x1374   :  { %2774 = vmatprep.mubr.msk.bf16.mxu0 %vm3205_vm0, %v3204_v0 }
0x1446   :  { %v740_v1 = vpop.f32.mrb[16].mxu0 }
0x1447   :  { %v747_v2 = vrot.slane %v740_v1, 2  ;;  %v2760_v3 = vpop.f32.mrb[17].mxu0 }
0x1448   :  { %v743_v4 = vpop.f32.mrb[18].mxu0 }
0x1449   :  { %v749_v5 = vadd.f32 %v747_v2, %v3336_v20  ;;  %v2761_v6 = vpop.f32.mrb[19].mxu0  ;;  %v60_v20 = vld [vmem:[%s3877_s6 + $0x10] sm:$0xff] }
0x144a   :  { %v3447_v24 = vpack.c.bf16 %v61_v22, %v60_v20 }
0x144b   :  { %3033 = vtanh.f32 %v749_v5  ;;  %v2553_v9 = vmul.f32 -1.442695, %v749_v5 }
0x144c   :  { %2771 = vmatpush3.bf16.msra.mxu0 %v3447_v24 }
0x144d   :  { %3035 = vpow2.f32 %v2553_v9  ;;  %2772 = vmatprep.subr.bf16.mxu0 %v3204_v0 }
0x1450   :  { %2773 = vmatpush3.bf16.msra.mxu0 %v3465_v29 }
0x1451   :  { %2786 = vmatprep.subr.bf16.mxu0 %v3204_v0 }
0x1453   :  { %2775 = vmatmul.mubr.msk.bf16.vlgmr.msra.gmra.mrb[20].mxu0 %vm156_vm2, %v844_v32 }
0x1454   :  { %2787 = vmatpush3.bf16.msra.mxu0 %v3447_v24  ;;  %2790 = vmatprep.mubr.msk.bf16.mxu0 %vm3205_vm0, %v3204_v0 }
0x1455   :  { %v3034_v7 = vpop.eup %3033  ;;  %2788 = vmatprep.subr.bf16.mxu0 %v3204_v0 }
0x1456   :  { %762 = vrot.lane.b32.xlu1 %v3034_v7, %s3206_s17 }
0x1457   :  { %v3036_v10 = vpop.eup %3035 }
0x1458   :  { %v753_v11 = vadd.f32 1.0, %v3036_v10  ;;  %2789 = vmatpush3.bf16.msra.mxu0 %v3465_v29 }
0x1459   :  { %2802 = vmatprep.subr.bf16.mxu0 %v3204_v0 }
0x145a   :  { %3037 = vrcp.f32 %v753_v11 }
0x1464   :  { %v3038_v13 = vpop.eup %3037 }
0x1465   :  { %v760_v17 = vmul.f32 %v3038_v13, %v758_v16 }
0x14c8   :  { %v763_v14 = vpop.permute.xlu1 %762 }
0x14c9   :  { %v765_v15 = vmul.f32 %v3038_v13, %v763_v14 }
0x14cb   :  { %767 = vrot.lane.b32.xlu0 %v765_v15, %s3202_s19 }
0x1526   :  { %v882_v39 = vpop.f32.mrb[20].mxu0 }
0x1527   :  { %v2776_v40 = vpop.f32.mrb[21].mxu0 }
0x1528   :  { %v885_v41 = vpop.f32.mrb[22].mxu0 }
0x1529   :  { %v2777_v42 = vpop.f32.mrb[23].mxu0 }
0x153d   :  { %v768_v19 = vpop.permute.xlu0 %767 }
0x153e   :  { %v770_v21 = vadd.f32 %v768_v19, %v760_v17 }
0x1540   :  { %3039 = vtanh.f32 %v770_v21 }
0x154a   :  { %v3040_v33 = vpop.eup %3039 }
0x154b   :  { %773 = vrot.lane.b32.xlu1 %v3040_v33, %s3206_s17 }
0x15bd   :  { %v774_v34 = vpop.permute.xlu1 %773 }
0x15be   :  { %v776_v35 = vmul.f32 %v3038_v13, %v774_v34 }
0x15c0   :  { %v785_v36 = vsel %vm781_vm5, %v784_v61, %v776_v35 }
0x15c1   :  { %v786_v37 = vpack.c.bf16 %v785_v36, %v3390_v53  ;;  %v2554_v53 = vld [vmem:[%s3878_s7 + $0x1] ss:$0 sm:$0xff] }
0x15c3   :  { %794 = vrot.lane.b32.xlu0 %v786_v37, %s3202_s19 }
0x15c7   :  { %897 = vrot.lane.b32.xlu0 %v2556_v38, %s3202_s19 }
0x1635   :  { %v795_v43 = vpop.permute.xlu0 %794 }
0x1636   :  { %2767 = vmatmul.mubr.msk.bf16.vlgmr.msra.gmra.mrb[16].mxu1 %vm156_vm2, %v795_v43 }
0x1637   :  { %2779 = vmatpush3.bf16.msra.mxu1 %v3447_v24  ;;  %2782 = vmatprep.mubr.msk.bf16.mxu1 %vm3205_vm0, %v3204_v0 }
0x1638   :  { %2780 = vmatprep.subr.bf16.mxu1 %v3204_v0 }
0x1639   :  { %v898_v58 = vpop.permute.xlu0 %897 }
0x163b   :  { %2781 = vmatpush3.bf16.msra.mxu1 %v3465_v29 }
0x163c   :  { %2794 = vmatprep.subr.bf16.mxu1 %v3204_v0 }
0x1709   :  { %v833_v44 = vpop.f32.mrb[16].mxu1 }
0x170a   :  { %v3497_v45 = vadd.f32 %v2554_v53, %v833_v44  ;;  %v2768_v46 = vpop.f32.mrb[17].mxu1 }
0x170b   :  { %v836_v47 = vpop.f32.mrb[18].mxu1 }
0x170c   :  { %v888_v48 = vadd.f32 %v882_v39, %v3497_v45  ;;  %v3500_v49 = vadd.f32 %v2554_v53, %v836_v47  ;;  %v2769_v18 = vpop.f32.mrb[19].mxu1 }
0x170e   :  { %3041 = vtanh.f32 %v888_v48  ;;  %v2558_v51 = vmul.f32 -1.442695, %v888_v48 }
0x1710   :  { %3043 = vpow2.f32 %v2558_v51 }
0x1718   :  { %v3042_v50 = vpop.eup %3041 }
0x1719   :  { %902 = vrot.lane.b32.xlu1 %v3042_v50, %s3206_s17 }
0x171a   :  { %v3044_v52 = vpop.eup %3043 }
0x171b   :  { %v892_v54 = vadd.f32 1.0, %v3044_v52 }
0x171d   :  { %3045 = vrcp.f32 %v892_v54 }
0x1727   :  { %v3046_v55 = vpop.eup %3045 }
0x1728   :  { %v900_v59 = vmul.f32 %v3046_v55, %v898_v58 }
0x178b   :  { %v903_v56 = vpop.permute.xlu1 %902 }
0x178c   :  { %v905_v57 = vmul.f32 %v3046_v55, %v903_v56 }
0x178e   :  { %907 = vrot.lane.b32.xlu1 %v905_v57, %s3202_s19 }
0x1800   :  { %v908_v60 = vpop.permute.xlu1 %907 }
0x1801   :  { %v910_v61 = vadd.f32 %v908_v60, %v900_v59 }
0x1803   :  { %3047 = vtanh.f32 %v910_v61  ;;  %v976_v21 = vrot.slane %v910_v61, 6 }
0x180d   :  { %v3048_v62 = vpop.eup %3047 }
0x180e   :  { %913 = vrot.lane.b32.xlu0 %v3048_v62, %s3206_s17 }
0x1880   :  { %v914_v63 = vpop.permute.xlu0 %913 }
0x1881   :  { %v3505_v1 = vmul.f32 %v3046_v55, %v914_v63 }
0x1883   :  { %v917_v2 = vpack.c.bf16 %v3505_v1, %v3505_v1  ;;  %v2002_v27 = vrot.slane %v3505_v1, 1 }
0x1885   :  { %919 = vrot.lane.b32.xlu1 %v917_v2, %s3202_s19 }
0x18f7   :  { %v920_v3 = vpop.permute.xlu1 %919 }
0x18f8   :  { %2783 = vmatmul.mubr.msk.bf16.vlgmr.msra.gmra.mrb[20].mxu1 %vm156_vm2, %v920_v3 }
0x18f9   :  { %2795 = vmatpush3.bf16.msra.mxu1 %v3447_v24  ;;  %2798 = vmatprep.mubr.msk.bf16.mxu1 %vm3205_vm0, %v3204_v0 }
0x18fa   :  { %2796 = vmatprep.subr.bf16.mxu1 %v3204_v0 }
0x18fd   :  { %2797 = vmatpush3.bf16.msra.mxu1 %v3465_v29 }
0x18fe   :  { %2810 = vmatprep.subr.bf16.mxu1 %v3204_v0 }
0x19cb   :  { %v958_v4 = vpop.f32.mrb[20].mxu1 }
0x19cc   :  { %v965_v5 = vrot.slane %v958_v4, 6  ;;  %v2784_v6 = vpop.f32.mrb[21].mxu1 }
0x19cd   :  { %v961_v7 = vpop.f32.mrb[22].mxu1 }
0x19ce   :  { %v967_v9 = vadd.f32 %v965_v5, %v3497_v45  ;;  %v2785_v10 = vpop.f32.mrb[23].mxu1 }
0x19d0   :  { %3049 = vtanh.f32 %v967_v9  ;;  %v2560_v13 = vmul.f32 -1.442695, %v967_v9 }
0x19d2   :  { %3051 = vpow2.f32 %v2560_v13 }
0x19da   :  { %v3050_v11 = vpop.eup %3049 }
0x19db   :  { %980 = vrot.lane.b32.xlu0 %v3050_v11, %s3206_s17 }
0x19dc   :  { %v3052_v14 = vpop.eup %3051 }
0x19dd   :  { %v971_v15 = vadd.f32 1.0, %v3052_v14 }
0x19df   :  { %3053 = vrcp.f32 %v971_v15 }
0x19e9   :  { %v3054_v16 = vpop.eup %3053 }
0x19ea   :  { %v978_v20 = vmul.f32 %v3054_v16, %v976_v21 }
0x1a4d   :  { %v981_v17 = vpop.permute.xlu0 %980 }
0x1a4e   :  { %v983_v19 = vmul.f32 %v3054_v16, %v981_v17 }
0x1a50   :  { %985 = vrot.lane.b32.xlu1 %v983_v19, %s3202_s19 }
0x1ac2   :  { %v986_v22 = vpop.permute.xlu1 %985 }
0x1ac3   :  { %v988_v23 = vadd.f32 %v986_v22, %v978_v20 }
0x1ac5   :  { %3055 = vtanh.f32 %v988_v23  ;;  %v1055_v46 = vrot.slane %v988_v23, 6 }
0x1acf   :  { %v3056_v8 = vpop.eup %3055 }
0x1ad0   :  { %991 = vrot.lane.b32.xlu0 %v3056_v8, %s3206_s17 }
0x1b42   :  { %v992_v25 = vpop.permute.xlu0 %991 }
0x1b43   :  { %v994_v26 = vmul.f32 %v3054_v16, %v992_v25 }
0x1b45   :  { %v2004_v12 = vrot.slane %v994_v26, 2  ;;  %v995_v28 = vpack.c.bf16 %v994_v26, %v994_v26  ;;  %v1466_v51 = vrot.slane %v994_v26, 1 }
0x1b47   :  { %v2016_v30 = vsel %vm1486_vm6, %v2002_v27, %v2004_v12  ;;  %v997_v31 = vrot.slane %v995_v28, 1  ;;  %v1487_v58 = vsel %vm1486_vm6, %v3505_v1, %v1466_v51 }
0x1b49   :  { %998 = vrot.lane.b32.xlu1 %v997_v31, %s3202_s19 }
0x1bbb   :  { %v999_v32 = vpop.permute.xlu1 %998 }
0x1bbc   :  { %2791 = vmatmul.mubr.msk.bf16.vlgmr.msra.gmra.mrb[24].mxu0 %vm156_vm2, %v999_v32 }
0x1bbd   :  { %2803 = vmatpush3.bf16.msra.mxu0 %v3447_v24  ;;  %2806 = vmatprep.mubr.msk.bf16.mxu0 %vm3205_vm0, %v3204_v0 }
0x1bbe   :  { %2804 = vmatprep.subr.bf16.mxu0 %v3204_v0 }
0x1bc1   :  { %2805 = vmatpush3.bf16.msra.mxu0 %v3465_v29 }
0x1bc2   :  { %2818 = vmatprep.subr.bf16.mxu0 %v3204_v0 }
0x1c8f   :  { %v1037_v33 = vpop.f32.mrb[24].mxu0 }
0x1c90   :  { %v1044_v34 = vrot.slane %v1037_v33, 4  ;;  %v2792_v35 = vpop.f32.mrb[25].mxu0 }
0x1c91   :  { %v1040_v36 = vpop.f32.mrb[26].mxu0 }
0x1c92   :  { %v1046_v37 = vadd.f32 %v1044_v34, %v3497_v45  ;;  %v2793_v38 = vpop.f32.mrb[27].mxu0 }
0x1c94   :  { %3057 = vtanh.f32 %v1046_v37  ;;  %v2562_v40 = vmul.f32 -1.442695, %v1046_v37 }
0x1c96   :  { %3059 = vpow2.f32 %v2562_v40 }
0x1c9e   :  { %v3058_v39 = vpop.eup %3057 }
0x1c9f   :  { %1059 = vrot.lane.b32.xlu0 %v3058_v39, %s3206_s17 }
0x1ca0   :  { %v3060_v41 = vpop.eup %3059 }
0x1ca1   :  { %v1050_v42 = vadd.f32 1.0, %v3060_v41 }
0x1ca3   :  { %3061 = vrcp.f32 %v1050_v42 }
0x1cad   :  { %v3062_v43 = vpop.eup %3061 }
0x1cae   :  { %v1057_v47 = vmul.f32 %v3062_v43, %v1055_v46 }
0x1d11   :  { %v1060_v53 = vpop.permute.xlu0 %1059 }
0x1d12   :  { %v1062_v44 = vmul.f32 %v3062_v43, %v1060_v53 }
0x1d14   :  { %1064 = vrot.lane.b32.xlu1 %v1062_v44, %s3202_s19 }
0x1d86   :  { %v1065_v48 = vpop.permute.xlu1 %1064 }
0x1d87   :  { %v1067_v18 = vadd.f32 %v1065_v48, %v1057_v47 }
0x1d89   :  { %3063 = vtanh.f32 %v1067_v18  ;;  %v1134_v15 = vrot.slane %v1067_v18, 6 }
0x1d93   :  { %v3064_v50 = vpop.eup %3063 }
0x1d94   :  { %1070 = vrot.lane.b32.xlu0 %v3064_v50, %s3206_s17 }
0x1e06   :  { %v1071_v52 = vpop.permute.xlu0 %1070 }
0x1e07   :  { %v1073_v54 = vmul.f32 %v3062_v43, %v1071_v52 }
0x1e09   :  { %v1469_v55 = vrot.slane %v1073_v54, 2  ;;  %v2006_v56 = vrot.slane %v1073_v54, 3  ;;  %v1074_v57 = vpack.c.bf16 %v1073_v54, %v1073_v54 }
0x1e0b   :  { %v1488_v59 = vsel %vm777_vm3, %v1487_v58, %v1469_v55  ;;  %v2017_v60 = vsel %vm777_vm3, %v2016_v30, %v2006_v56  ;;  %v1076_v61 = vrot.slane %v1074_v57, 2 }
0x1e0d   :  { %1077 = vrot.lane.b32.xlu1 %v1076_v61, %s3202_s19 }
0x1e7f   :  { %v1078_v62 = vpop.permute.xlu1 %1077 }
0x1e80   :  { %2799 = vmatmul.mubr.msk.bf16.vlgmr.msra.gmra.mrb[24].mxu1 %vm156_vm2, %v1078_v62 }
0x1e81   :  { %2811 = vmatpush3.bf16.msra.mxu1 %v3447_v24  ;;  %2814 = vmatprep.mubr.msk.bf16.mxu1 %vm3205_vm0, %v3204_v0 }
0x1e82   :  { %2812 = vmatprep.subr.bf16.mxu1 %v3204_v0 }
0x1e85   :  { %2813 = vmatpush3.bf16.msra.mxu1 %v3465_v29 }
0x1e86   :  { %2826 = vmatprep.subr.bf16.mxu1 %v3204_v0 }
0x1f53   :  { %v1116_v63 = vpop.f32.mrb[24].mxu1 }
0x1f54   :  { %v1123_v1 = vrot.slane %v1116_v63, 2  ;;  %v2800_v2 = vpop.f32.mrb[25].mxu1 }
0x1f55   :  { %v1119_v3 = vpop.f32.mrb[26].mxu1 }
0x1f56   :  { %v1125_v4 = vadd.f32 %v1123_v1, %v3497_v45  ;;  %v2801_v5 = vpop.f32.mrb[27].mxu1 }
0x1f58   :  { %3065 = vtanh.f32 %v1125_v4  ;;  %v2564_v7 = vmul.f32 -1.442695, %v1125_v4 }
0x1f5a   :  { %3067 = vpow2.f32 %v2564_v7 }
0x1f62   :  { %v3066_v6 = vpop.eup %3065 }
0x1f63   :  { %1138 = vrot.lane.b32.xlu0 %v3066_v6, %s3206_s17 }
0x1f64   :  { %v3068_v9 = vpop.eup %3067 }
0x1f65   :  { %v1129_v10 = vadd.f32 1.0, %v3068_v9 }
0x1f67   :  { %3069 = vrcp.f32 %v1129_v10 }
0x1f71   :  { %v3070_v11 = vpop.eup %3069 }
0x1f72   :  { %v1136_v16 = vmul.f32 %v3070_v11, %v1134_v15 }
0x1fd5   :  { %v1139_v13 = vpop.permute.xlu0 %1138 }
0x1fd6   :  { %v1141_v14 = vmul.f32 %v3070_v11, %v1139_v13 }
0x1fd8   :  { %1143 = vrot.lane.b32.xlu1 %v1141_v14, %s3202_s19 }
0x204a   :  { %v1144_v17 = vpop.permute.xlu1 %1143 }
0x204b   :  { %v1146_v19 = vadd.f32 %v1144_v17, %v1136_v16 }
0x204d   :  { %3071 = vtanh.f32 %v1146_v19  ;;  %v1210_v41 = vrot.slane %v1146_v19, 6 }
0x2057   :  { %v3072_v45 = vpop.eup %3071 }
0x2058   :  { %1149 = vrot.lane.b32.xlu0 %v3072_v45, %s3206_s17 }
0x20ca   :  { %v1150_v21 = vpop.permute.xlu0 %1149 }
0x20cb   :  { %v1152_v20 = vmul.f32 %v3070_v11, %v1150_v21 }
0x20cd   :  { %v1472_v22 = vrot.slane %v1152_v20, 3  ;;  %v2008_v23 = vrot.slane %v1152_v20, 4  ;;  %v1153_v8 = vpack.c.bf16 %v1152_v20, %v1152_v20 }
0x20cf   :  { %v1490_v25 = vsel %vm1489_vm7, %v1488_v59, %v1472_v22  ;;  %v2018_v26 = vsel %vm1489_vm7, %v2017_v60, %v2008_v23  ;;  %v1155_v27 = vrot.slane %v1153_v8, 3 }
0x20d1   :  { %1156 = vrot.lane.b32.xlu1 %v1155_v27, %s3202_s19 }
0x2143   :  { %v1157_v12 = vpop.permute.xlu1 %1156 }
0x2144   :  { %2807 = vmatmul.mubr.msk.bf16.vlgmr.msra.gmra.mrb[28].mxu0 %vm156_vm2, %v1157_v12 }
0x2145   :  { %2819 = vmatpush3.bf16.msra.mxu0 %v3447_v24  ;;  %2822 = vmatprep.mubr.msk.bf16.mxu0 %vm3205_vm0, %v3204_v0 }
0x2146   :  { %2820 = vmatprep.subr.bf16.mxu0 %v3204_v0 }
0x2149   :  { %2821 = vmatpush3.bf16.msra.mxu0 %v3465_v29 }
0x214a   :  { %2834 = vmatprep.subr.bf16.mxu0 %v3204_v0 }
0x2217   :  { %v1195_v28 = vpop.f32.mrb[28].mxu0 }
0x2218   :  { %v1201_v30 = vadd.f32 %v1195_v28, %v3500_v49  ;;  %v2808_v31 = vpop.f32.mrb[29].mxu0 }
0x2219   :  { %v1198_v32 = vpop.f32.mrb[30].mxu0 }
0x221a   :  { %3073 = vtanh.f32 %v1201_v30  ;;  %v2809_v33 = vpop.f32.mrb[31].mxu0  ;;  %v2566_v35 = vmul.f32 -1.442695, %v1201_v30 }
0x221c   :  { %3075 = vpow2.f32 %v2566_v35 }
0x2224   :  { %v3074_v34 = vpop.eup %3073 }
0x2225   :  { %1214 = vrot.lane.b32.xlu0 %v3074_v34, %s3206_s17 }
0x2226   :  { %v3076_v36 = vpop.eup %3075 }
0x2227   :  { %v1205_v37 = vadd.f32 1.0, %v3076_v36 }
0x2229   :  { %3077 = vrcp.f32 %v1205_v37 }
0x2233   :  { %v3078_v38 = vpop.eup %3077 }
0x2234   :  { %v1212_v42 = vmul.f32 %v3078_v38, %v1210_v41 }
0x2297   :  { %v1215_v39 = vpop.permute.xlu0 %1214 }
0x2298   :  { %v1217_v40 = vmul.f32 %v3078_v38, %v1215_v39 }
0x229a   :  { %1219 = vrot.lane.b32.xlu1 %v1217_v40, %s3202_s19 }
0x230c   :  { %v1220_v43 = vpop.permute.xlu1 %1219 }
0x230d   :  { %v1222_v53 = vadd.f32 %v1220_v43, %v1212_v42 }
0x230f   :  { %3079 = vtanh.f32 %v1222_v53  ;;  %v1288_v3 = vrot.slane %v1222_v53, 6 }
0x2319   :  { %v3080_v44 = vpop.eup %3079 }
0x231a   :  { %1225 = vrot.lane.b32.xlu0 %v3080_v44, %s3206_s17 }
0x238c   :  { %v1226_v46 = vpop.permute.xlu0 %1225 }
0x238d   :  { %v1228_v47 = vmul.f32 %v3078_v38, %v1226_v46 }
0x238f   :  { %v1475_v48 = vrot.slane %v1228_v47, 4  ;;  %v2010_v18 = vrot.slane %v1228_v47, 5  ;;  %v1229_v50 = vpack.c.bf16 %v1228_v47, %v1228_v47 }
0x2391   :  { %1231 = vrot.lane.b32.xlu1 %v1229_v50, %s3202_s19  ;;  %v1491_v51 = vsel %vm779_vm4, %v1490_v25, %v1475_v48  ;;  %v2019_v52 = vsel %vm779_vm4, %v2018_v26, %v2010_v18 }
0x2403   :  { %v1232_v54 = vpop.permute.xlu1 %1231 }
0x2404   :  { %2815 = vmatmul.mubr.msk.bf16.vlgmr.msra.gmra.mrb[28].mxu1 %vm156_vm2, %v1232_v54 }
0x2405   :  { %2827 = vmatpush3.bf16.msra.mxu1 %v3447_v24  ;;  %2830 = vmatprep.mubr.msk.bf16.mxu1 %vm3205_vm0, %v3204_v0 }
0x2406   :  { %2828 = vmatprep.subr.bf16.mxu1 %v3204_v0 }
0x2409   :  { %2829 = vmatpush3.bf16.msra.mxu1 %v3465_v29 }
0x240a   :  { %2842 = vmatprep.subr.bf16.mxu1 %v3204_v0 }
0x24d7   :  { %v1270_v55 = vpop.f32.mrb[28].mxu1 }
0x24d8   :  { %v1277_v56 = vrot.slane %v1270_v55, 6  ;;  %v2816_v57 = vpop.f32.mrb[29].mxu1 }
0x24d9   :  { %v1273_v58 = vpop.f32.mrb[30].mxu1 }
0x24da   :  { %v1279_v59 = vadd.f32 %v1277_v56, %v3500_v49  ;;  %v2817_v60 = vpop.f32.mrb[31].mxu1 }
0x24dc   :  { %3081 = vtanh.f32 %v1279_v59  ;;  %v2568_v24 = vmul.f32 -1.442695, %v1279_v59 }
0x24de   :  { %3083 = vpow2.f32 %v2568_v24 }
0x24e6   :  { %v3082_v61 = vpop.eup %3081 }
0x24e7   :  { %1292 = vrot.lane.b32.xlu0 %v3082_v61, %s3206_s17 }
0x24e8   :  { %v3084_v62 = vpop.eup %3083 }
0x24e9   :  { %v1283_v63 = vadd.f32 1.0, %v3084_v62 }
0x24eb   :  { %3085 = vrcp.f32 %v1283_v63  ;;  %v67_v63 = vld [vmem:[%s3877_s6 + $0x50] sm:$0xff] }
0x24f5   :  { %v3086_v1 = vpop.eup %3085 }
0x24f6   :  { %v1290_v4 = vmul.f32 %v3086_v1, %v1288_v3  ;;  %v72_v3 = vld [vmem:[%s3877_s6 + $0x20] sm:$0xff] }
0x2559   :  { %v1293_v29 = vpop.permute.xlu0 %1292 }
0x255a   :  { %v1295_v2 = vmul.f32 %v3086_v1, %v1293_v29 }
0x255c   :  { %1297 = vrot.lane.b32.xlu1 %v1295_v2, %s3202_s19  ;;  %v69_v2 = vld [vmem:[%s3877_s6 + $0xc0] sm:$0xff] }
0x25ce   :  { %v1298_v5 = vpop.permute.xlu1 %1297 }
0x25cf   :  { %v1300_v6 = vadd.f32 %v1298_v5, %v1290_v4  ;;  %v73_v4 = vld [vmem:[%s3877_s6 + $0x58] sm:$0xff]  ;;  %v74_v5 = vld [vmem:[%s3877_s6 + $0x90] sm:$0xff] }
0x25d1   :  { %3087 = vtanh.f32 %v1300_v6  ;;  %v1367_v32 = vrot.slane %v1300_v6, 6 }
0x25db   :  { %v3088_v7 = vpop.eup %3087 }
0x25dc   :  { %1303 = vrot.lane.b32.xlu0 %v3088_v7, %s3206_s17  ;;  %v1550_v7 = vld [vmem:[%s3874_s3] sm:$0xff] }
0x264e   :  { %v1304_v9 = vpop.permute.xlu0 %1303 }
0x264f   :  { %v1306_v10 = vmul.f32 %v3086_v1, %v1304_v9  ;;  %v68_v1 = vld [vmem:[%s3877_s6 + $0x88] sm:$0xff] }
0x2650   :  { %v3620_v6 = vpack.c.bf16 %v69_v2, %v68_v1  ;;  %v1551_v9 = vld [vmem:[%s3874_s3 + $0x8] sm:$0x3] }
0x2651   :  { %v1478_v11 = vrot.slane %v1306_v10, 5  ;;  %v2012_v13 = vrot.slane %v1306_v10, 6  ;;  %v1307_v14 = vpack.c.bf16 %v1306_v10, %v1306_v10  ;;  %v3628_v10 = vpack.c.bf16 %v73_v4, %v72_v3 }
0x2653   :  { %v1309_v15 = vrot.slane %v1307_v14, 1  ;;  %v1493_v16 = vsel %vm1492_vm8, %v1491_v51, %v1478_v11  ;;  %v2020_v17 = vsel %vm1492_vm8, %v2019_v52, %v2012_v13  ;;  %v75_v11 = vld [vmem:[%s3877_s6 + $0xc8] sm:$0xff] }
0x2654   :  { %v3635_v14 = vpack.c.bf16 %v75_v11, %v74_v5 }
0x2655   :  { %1310 = vrot.lane.b32.xlu1 %v1309_v15, %s3202_s19  ;;  %v1552_v15 = vpack.c.bf16 %v1551_v9, %v1550_v7 }
0x26c7   :  { %v1311_v19 = vpop.permute.xlu1 %1310 }
0x26c8   :  { %2823 = vmatmul.mubr.msk.bf16.vlgmr.msra.gmra.mrb[32].mxu0 %vm156_vm2, %v1311_v19 }
0x26c9   :  { %2838 = vmatprep.mubr.msk.bf16.mxu0 %vm3205_vm0, %v3204_v0  ;;  %2835 = vmatpush3.bf16.msra.mxu0 %v3628_v10 }
0x26ca   :  { %2836 = vmatprep.subr.bf16.mxu0 %v3204_v0 }
0x26cd   :  { %2837 = vmatpush3.bf16.msra.mxu0 %v3635_v14 }
0x26ce   :  { %2850 = vmatprep.subr.bf16.mxu0 %v3204_v0 }
0x279b   :  { %v1349_v45 = vpop.f32.mrb[32].mxu0 }
0x279c   :  { %v1356_v21 = vrot.slane %v1349_v45, 4  ;;  %v2824_v20 = vpop.f32.mrb[33].mxu0 }
0x279d   :  { %v1352_v22 = vpop.f32.mrb[34].mxu0 }
0x279e   :  { %v1358_v23 = vadd.f32 %v1356_v21, %v3500_v49  ;;  %v2825_v8 = vpop.f32.mrb[35].mxu0  ;;  %v3652_v22 = vld [vmem:[%s3878_s7 + $0x2] ss:$0 sm:$0xff] }
0x27a0   :  { %3089 = vtanh.f32 %v1358_v23  ;;  %v2570_v26 = vmul.f32 -1.442695, %v1358_v23 }
0x27a2   :  { %3091 = vpow2.f32 %v2570_v26 }
0x27aa   :  { %v3090_v25 = vpop.eup %3089 }
0x27ab   :  { %1371 = vrot.lane.b32.xlu0 %v3090_v25, %s3206_s17 }
0x27ac   :  { %v3092_v27 = vpop.eup %3091 }
0x27ad   :  { %v1362_v12 = vadd.f32 1.0, %v3092_v27 }
0x27af   :  { %3093 = vrcp.f32 %v1362_v12 }
0x27b9   :  { %v3094_v28 = vpop.eup %3093 }
0x27ba   :  { %v1369_v33 = vmul.f32 %v3094_v28, %v1367_v32  ;;  %v78_v32 = vld [vmem:[%s3877_s6 + $0x28] sm:$0xff] }
0x281d   :  { %v1372_v30 = vpop.permute.xlu0 %1371 }
0x281e   :  { %v1374_v31 = vmul.f32 %v3094_v28, %v1372_v30 }
0x2820   :  { %1376 = vrot.lane.b32.xlu1 %v1374_v31, %s3202_s19 }
0x2892   :  { %v1377_v34 = vpop.permute.xlu1 %1376 }
0x2893   :  { %v1379_v35 = vadd.f32 %v1377_v34, %v1369_v33  ;;  %v79_v33 = vld [vmem:[%s3877_s6 + $0x60] sm:$0xff] }
0x2894   :  { %v3674_v34 = vpack.c.bf16 %v79_v33, %v78_v32 }
0x2895   :  { %3095 = vtanh.f32 %v1379_v35  ;;  %v1446_v60 = vrot.slane %v1379_v35, 6 }
0x289f   :  { %v3096_v36 = vpop.eup %3095 }
0x28a0   :  { %1382 = vrot.lane.b32.xlu0 %v3096_v36, %s3206_s17 }
0x2912   :  { %v1383_v37 = vpop.permute.xlu0 %1382 }
0x2913   :  { %v1385_v38 = vmul.f32 %v3094_v28, %v1383_v37 }
0x2915   :  { %v1481_v39 = vrot.slane %v1385_v38, 6  ;;  %v2014_v40 = vrot.slane %v1385_v38, 7  ;;  %v1386_v41 = vpack.c.bf16 %v1385_v38, %v1385_v38  ;;  %v3686_v38 = vld [vmem:[%s3878_s7 + $0x3] ss:$0 sm:$0xff] }
0x2917   :  { %v1388_v42 = vrot.slane %v1386_v41, 2  ;;  %v1494_v43 = vsel %vm781_vm5, %v1493_v16, %v1481_v39  ;;  %v2021_v53 = vsel %vm781_vm5, %v2020_v17, %v2014_v40 }
0x2919   :  { %1389 = vrot.lane.b32.xlu1 %v1388_v42, %s3202_s19 }
0x298b   :  { %v1390_v44 = vpop.permute.xlu1 %1389 }
0x298c   :  { %2831 = vmatmul.mubr.msk.bf16.vlgmr.msra.gmra.mrb[32].mxu1 %vm156_vm2, %v1390_v44 }
0x298d   :  { %2846 = vmatprep.mubr.msk.bf16.mxu1 %vm3205_vm0, %v3204_v0 }
0x2a5f   :  { %v1428_v46 = vpop.f32.mrb[32].mxu1 }
0x2a60   :  { %v1435_v47 = vrot.slane %v1428_v46, 2  ;;  %v2832_v48 = vpop.f32.mrb[33].mxu1 }
0x2a61   :  { %v1431_v18 = vpop.f32.mrb[34].mxu1 }
0x2a62   :  { %v1437_v50 = vadd.f32 %v1435_v47, %v3500_v49  ;;  %v2833_v51 = vpop.f32.mrb[35].mxu1  ;;  %v66_v49 = vld [vmem:[%s3877_s6 + $0x18] sm:$0xff] }
0x2a63   :  { %v3605_v29 = vpack.c.bf16 %v67_v63, %v66_v49 }
0x2a64   :  { %3097 = vtanh.f32 %v1437_v50  ;;  %v2572_v54 = vmul.f32 -1.442695, %v1437_v50 }
0x2a65   :  { %2843 = vmatpush3.bf16.msra.mxu1 %v3605_v29 }
0x2a66   :  { %3099 = vpow2.f32 %v2572_v54  ;;  %2844 = vmatprep.subr.bf16.mxu1 %v3204_v0 }
0x2a69   :  { %2845 = vmatpush3.bf16.msra.mxu1 %v3620_v6 }
0x2a6a   :  { %2856 = vmatprep.subr.bf16.mxu1 %v3204_v0 }
0x2a6c   :  { %2847 = vmatmul.mubr.msk.bf16.vlgmr.msra.gmra.mrb[36].mxu1 %vm156_vm2, %v1552_v15 }
0x2a6d   :  { %2858 = vmatprep.mubr.msk.bf16.mxu1 %vm3205_vm0, %v3204_v0  ;;  %2857 = vmatpush3.bf16.msra.mxu1 %v3674_v34 }
0x2a6e   :  { %v3098_v52 = vpop.eup %3097  ;;  %2868 = vmatprep.subr.bf16.mxu1 %v3204_v0 }
0x2a6f   :  { %1450 = vrot.lane.b32.xlu0 %v3098_v52, %s3206_s17  ;;  %v1661_v52 = vlaneseq }
0x2a70   :  { %v3100_v55 = vpop.eup %3099 }
0x2a71   :  { %v1441_v56 = vadd.f32 1.0, %v3100_v55  ;;  %v3698_v54 = vshrl.u32 %v1661_v52, 7  ;;  %v1603_v55 = vld [vmem:[%s3875_s4] sm:$0x1] }
0x2a73   :  { %3101 = vrcp.f32 %v1441_v56  ;;  %v1604_v56 = vmul.f32 -1e+09, %v1603_v55  ;;  %v87_v55 = vld [vmem:[%s3877_s6 + $0xd8] sm:$0xff] }
0x2a7d   :  { %v3102_v57 = vpop.eup %3101 }
0x2a7e   :  { %v1448_v61 = vmul.f32 %v3102_v57, %v1446_v60 }
0x2ae1   :  { %v1451_v58 = vpop.permute.xlu0 %1450 }
0x2ae2   :  { %v1453_v59 = vmul.f32 %v3102_v57, %v1451_v58 }
0x2ae4   :  { %1455 = vrot.lane.b32.xlu1 %v1453_v59, %s3202_s19 }
0x2b3f   :  { %v1596_v23 = vpop.f32.mrb[36].mxu1 }
0x2b40   :  { %v1597_v8 = vadd.f32 %v3652_v22, %v1596_v23  ;;  %v2848_v25 = vpop.f32.mrb[37].mxu1 }
0x2b41   :  { %v1599_v26 = vpop.f32.mrb[38].mxu1 }
0x2b42   :  { %v1600_v27 = vadd.f32 %v3652_v22, %v1599_v26  ;;  %v2849_v12 = vpop.f32.mrb[39].mxu1 }
0x2b43   :  { %v81_v12 = vld [vmem:[%s3877_s6 + $0xd0] sm:$0xff] }
0x2b44   :  { %v3656_v28 = vpack.c.bf16 %v1600_v27, %v1597_v8  ;;  %v80_v27 = vld [vmem:[%s3877_s6 + $0x98] sm:$0xff] }
0x2b46   :  { %v1618_v30 = vsel %vm108_vm1, %v3656_v28, 0 }
0x2b56   :  { %v1456_v24 = vpop.permute.xlu1 %1455 }
0x2b57   :  { %v1458_v62 = vadd.f32 %v1456_v24, %v1448_v61 }
0x2b59   :  { %3103 = vtanh.f32 %v1458_v62 }
0x2b63   :  { %v3104_v13 = vpop.eup %3103 }
0x2b64   :  { %1461 = vrot.lane.b32.xlu0 %v3104_v13, %s3206_s17 }
0x2b68   :  { %1679 = vrot.lane.b32.xlu0 %v3656_v28, %s3207_s2 }
0x2bd6   :  { %v1462_v16 = vpop.permute.xlu0 %1461 }
0x2bd7   :  { %v1464_v17 = vmul.f32 %v3102_v57, %v1462_v16  ;;  %v1663_v57 = vsub.s32 0, %v3698_v54 }
0x2bd9   :  { %v1484_v19 = vrot.slane %v1464_v17, 7  ;;  %v3646_v45 = vsel %vm1495_vm9, %v2021_v53, %v1464_v17  ;;  %v1664_v58 = vrot.slane %v1604_v56, %v1663_v57 }
0x2bda   :  { %v1680_v35 = vpop.permute.xlu0 %1679  ;;  %v2023_v25 = vpack.c.bf16 %v3646_v45, %v3646_v45 }
0x2bdb   :  { %v1496_v21 = vsel %vm1495_vm9, %v1494_v43, %v1484_v19  ;;  %2859 = vmatmul.mubr.msk.bf16.vlgmr.msra.gmra.mrb[40].mxu1 %vm108_vm1, %v1680_v35  ;;  %v84_v35 = vld [vmem:[%s3877_s6 + $0x30] sm:$0xff] }
0x2bdc   :  { %v1497_v20 = vpack.c.bf16 %v1496_v21, %v1496_v21  ;;  %2870 = vmatprep.mubr.msk.bf16.mxu1 %vm3205_vm0, %v3204_v0 }
0x2bde   :  { %1505 = vrot.lane.b32.xlu1 %v1497_v20, %s3202_s19 }
0x2be2   :  { %1778 = vrot.lane.b32.xlu1 %v3656_v28, %s3208_s0 }
0x2c50   :  { %v1506_v31 = vpop.permute.xlu1 %1505 }
0x2c51   :  { %2839 = vmatmul.mubr.msk.bf16.vlgmr.msra.gmra.mrb[36].mxu0 %vm156_vm2, %v1506_v31  ;;  %v3721_v31 = vpack.c.bf16 %v81_v12, %v80_v27 }
0x2c52   :  { %2851 = vmatpush3.bf16.xpose.msra.mxu0 %v1618_v30  ;;  %2852 = vmatprep.mubr.msk.bf16.mxu0 %vm3205_vm0, %v3204_v0 }
0x2c53   :  { %2862 = vmatprep.subr.bf16.mxu0 %v3204_v0 }
0x2c54   :  { %v1779_v36 = vpop.permute.xlu1 %1778 }
0x2c55   :  { %v1784_v37 = vsel %vm108_vm1, %v1779_v36, 0  ;;  %v85_v36 = vld [vmem:[%s3877_s6 + $0x68] sm:$0xff] }
0x2c56   :  { %2869 = vmatpush3.bf16.xpose.msra.mxu1 %v1784_v37  ;;  %v3737_v37 = vpack.c.bf16 %v85_v36, %v84_v35 }
0x2c57   :  { %2886 = vmatprep.subr.bf16.mxu1 %v3204_v0 }
0x2cae   :  { %v1718_v44 = vpop.f32.mrb[40].mxu1 }
0x2caf   :  { %v2860_v46 = vpop.f32.mrb[41].mxu1 }
0x2cb0   :  { %v1721_v47 = vpop.f32.mrb[42].mxu1 }
0x2cb1   :  { %v1726_v48 = vpack.c.bf16 %v1721_v47, %v1718_v44  ;;  %v2861_v18 = vpop.f32.mrb[43].mxu1 }
0x2cb3   :  { %v1731_v50 = vsel %vm1492_vm8, %v1726_v48, 0 }
0x2d24   :  { %v1544_v39 = vpop.f32.mrb[36].mxu0 }
0x2d25   :  { %v1545_v40 = vadd.f32 %v3686_v38, %v1544_v39  ;;  %v2840_v41 = vpop.f32.mrb[37].mxu0 }
0x2d26   :  { %v1547_v42 = vpop.f32.mrb[38].mxu0 }
0x2d27   :  { %v1612_v43 = vpack.c.bf16 %v1545_v40, %v1545_v40  ;;  %v2841_v53 = vpop.f32.mrb[39].mxu0 }
0x2d29   :  { %1776 = vrot.lane.b32.xlu0 %v1612_v43, %s3208_s0  ;;  %2853 = vmatmul.mubr.msk.bf16.vlgmr.msra.gmra.mrb[40].mxu0 %vm108_vm1, %v1612_v43 }
0x2d2a   :  { %2864 = vmatprep.mubr.msk.bf16.mxu0 %vm3205_vm0, %v3204_v0  ;;  %2863 = vmatpush3.bf16.msra.mxu0 %v1731_v50  ;;  %v2587_v50 = vld [vmem:[%s3874_s3 + $0x10] sm:$0xff] }
0x2d2b   :  { %2874 = vmatprep.subr.bf16.mxu0 %v3204_v0 }
0x2d9b   :  { %v1777_v51 = vpop.permute.xlu0 %1776 }
0x2d9c   :  { %2871 = vmatmul.mubr.msk.bf16.vlgmr.msra.gmra.mrb[44].mxu1 %vm108_vm1, %v1777_v51  ;;  %v2588_v51 = vld [vmem:[%s3874_s3 + $0x18] sm:$0x3] }
0x2d9d   :  { %2890 = vmatprep.mubr.msk.bf16.mxu1 %vm3205_vm0, %v3204_v0  ;;  %2887 = vmatpush3.bf16.msra.mxu1 %v3737_v37  ;;  %v2073_v52 = vpack.c.bf16 %v2588_v51, %v2587_v50 }
0x2d9e   :  { %2888 = vmatprep.subr.bf16.mxu1 %v3204_v0 }
0x2dfc   :  { %v1654_v59 = vpop.f32.mrb[40].mxu0 }
0x2dfd   :  { %v1660_v60 = vmul.f32 0.25, %v1654_v59  ;;  %v2854_v61 = vpop.f32.mrb[41].mxu0 }
0x2dfe   :  { %v1657_v24 = vpop.f32.mrb[42].mxu0 }
0x2dff   :  { %v2855_v62 = vpop.f32.mrb[43].mxu0  ;;  %v1665_v49 = vadd.f32 %v1664_v58, %v1660_v60 }
0x2e01   :  { %v1667_v63 = vsel %vm1666_vm10, %v1665_v49, -inf }
0x2e02   :  { %1668 = vmax.xlane.f32.xlu1 %v1667_v63 }
0x2e6f   :  { %v1820_v1 = vpop.f32.mrb[44].mxu1 }
0x2e70   :  { %v1826_v2 = vmul.f32 0.25, %v1820_v1  ;;  %v2872_v3 = vpop.f32.mrb[45].mxu1 }
0x2e71   :  { %v1823_v4 = vpop.f32.mrb[46].mxu1 }
0x2e72   :  { %v2873_v5 = vpop.f32.mrb[47].mxu1  ;;  %v1827_v7 = vadd.f32 %v1826_v2, %v1664_v58 }
0x2e74   :  { %v1828_v9 = vsel %vm1666_vm10, %v1827_v7, -inf }
0x2e75   :  { %1829 = vmax.xlane.f32.xlu1 %v1828_v9 }
0x2e8f   :  { %v1669_v11 = vpop.xlane.xlu1 %1668 }
0x2e90   :  { %v1670_v13 = vsub.f32 %v1665_v49, %v1669_v11 }
0x2e92   :  { %v1671_v15 = vmul.f32 1.442695, %v1670_v13 }
0x2e94   :  { %3105 = vpow2.f32 %v1671_v15 }
0x2e9e   :  { %v3106_v16 = vpop.eup %3105 }
0x2e9f   :  { %v1673_v17 = vsel %vm1666_vm10, %v3106_v16, 0.0 }
0x2ea0   :  { %1674 = vadd.xlane.f32.xlu0 %v1673_v17 }
0x2eb6   :  { %1839 = vrot.lane.b32.xlu0 %v3656_v28, %s3209_s1 }
0x2f02   :  { %v1830_v19 = vpop.xlane.xlu1 %1829 }
0x2f03   :  { %v1831_v21 = vsub.f32 %v1827_v7, %v1830_v19 }
0x2f05   :  { %v1832_v20 = vmul.f32 1.442695, %v1831_v21 }
0x2f07   :  { %3107 = vpow2.f32 %v1832_v20 }
0x2f11   :  { %v3108_v23 = vpop.eup %3107 }
0x2f12   :  { %v1834_v8 = vsel %vm1666_vm10, %v3108_v23, 0.0 }
0x2f13   :  { %1835 = vadd.xlane.f32.xlu1 %v1834_v8 }
0x2f24   :  { %2025 = vrot.lane.b32.xlu1 %v2023_v25, %s3202_s19 }
0x2f2d   :  { %v1675_v26 = vpop.xlane.xlu0 %1674 }
0x2f2e   :  { %3109 = vrcp.f32 %v1675_v26 }
0x2f31   :  { %v1840_v45 = vpop.permute.xlu0 %1839 }
0x2f38   :  { %v3110_v28 = vpop.eup %3109 }
0x2f39   :  { %v1677_v30 = vmul.f32 %v3110_v28, %v3106_v16 }
0x2f3b   :  { %v1725_v32 = vpack.c.bf16 %v1677_v30, %v1677_v30 }
0x2f3d   :  { %2865 = vmatmul.mubr.msk.bf16.vlgmr.msra.gmra.mrb[44].mxu0 %vm1666_vm10, %v1725_v32 }
0x2f3e   :  { %2875 = vmatpush3.bf16.msra.mxu0 %v3721_v31  ;;  %2876 = vmatprep.mubr.msk.bf16.mxu0 %vm3205_vm0, %v3204_v0 }
0x2f3f   :  { %2880 = vmatprep.subr.bf16.mxu0 %v3204_v0 }
0x2f45   :  { %2877 = vmatmul.mubr.msk.bf16.vlgmr.msra.gmra.mrb[48].mxu0 %vm108_vm1, %v1840_v45 }
0x2f46   :  { %2882 = vmatprep.mubr.msk.bf16.mxu0 %vm3205_vm0, %v3204_v0 }
0x2fa0   :  { %v1836_v33 = vpop.xlane.xlu1 %1835 }
0x2fa1   :  { %3111 = vrcp.f32 %v1836_v33 }
0x2fa4   :  { %v2026_v4 = vpop.permute.xlu1 %2025 }
0x2fab   :  { %v3112_v39 = vpop.eup %3111 }
0x2fac   :  { %v1838_v40 = vmul.f32 %v3112_v39, %v3108_v23 }
0x2fae   :  { %v1934_v41 = vadd.f32 %v1838_v40, %v1677_v30  ;;  %v1885_v18 = vpack.c.bf16 %v1838_v40, %v1838_v40  ;;  %v2118_v30 = vld [vmem:[%s3875_s4 + $0x1] sm:$0x1] }
0x2faf   :  { %v2119_v32 = vmul.f32 -1e+09, %v2118_v30 }
0x2fb0   :  { %v1935_v42 = vmul.f32 0.5, %v1934_v41 }
0x2fb1   :  { %v2172_v45 = vrot.slane %v2119_v32, %v1663_v57 }
0x2fb2   :  { %1936 = vst.msk [vmem:[#allocation6] sm:$0xff] %vm1666_vm10, %v1935_v42 }
0x3018   :  { %v1878_v43 = vpop.f32.mrb[48].mxu0 }
0x3019   :  { %v2878_v53 = vpop.f32.mrb[49].mxu0 }
0x301a   :  { %v1881_v44 = vpop.f32.mrb[50].mxu0 }
0x301b   :  { %v1886_v46 = vpack.c.bf16 %v1881_v44, %v1878_v43  ;;  %v2879_v47 = vpop.f32.mrb[51].mxu0 }
0x301d   :  { %v1891_v48 = vsel %vm1492_vm8, %v1886_v46, 0 }
0x301e   :  { %2881 = vmatpush3.bf16.msra.mxu0 %v1891_v48 }
0x301f   :  { %2902 = vmatprep.subr.bf16.mxu0 %v3204_v0 }
0x3021   :  { %2883 = vmatmul.mubr.msk.bf16.vlgmr.msra.gmra.mrb[44].mxu0 %vm1666_vm10, %v1885_v18 }
0x3022   :  { %2903 = vmatpush3.bf16.msra.mxu0 %v3605_v29  ;;  %2906 = vmatprep.mubr.msk.bf16.mxu0 %vm3205_vm0, %v3204_v0  ;;  %v86_v29 = vld [vmem:[%s3877_s6 + $0xa0] sm:$0xff] }
0x3023   :  { %2904 = vmatprep.subr.bf16.mxu0 %v3204_v0 }
0x3026   :  { %2905 = vmatpush3.bf16.msra.mxu0 %v3620_v6  ;;  %v3768_v6 = vpack.c.bf16 %v87_v55, %v86_v29 }
0x3027   :  { %2916 = vmatprep.subr.bf16.mxu0 %v3204_v0 }
0x3028   :  { %2889 = vmatpush3.bf16.msra.mxu1 %v3768_v6 }
0x3029   :  { %2907 = vmatmul.mubr.msk.bf16.vlgmr.msra.gmra.mrb[52].mxu0 %vm156_vm2, %v2073_v52  ;;  %2894 = vmatprep.subr.bf16.mxu1 %v3204_v0 }
0x302a   :  { %2917 = vmatpush3.bf16.msra.mxu0 %v3674_v34  ;;  %2918 = vmatprep.mubr.msk.bf16.mxu0 %vm3205_vm0, %v3204_v0  ;;  %v3775_v34 = vld [vmem:[%s3878_s7 + $0x4] ss:$0 sm:$0xff] }
0x302b   :  { %2928 = vmatprep.subr.bf16.mxu0 %v3204_v0 }
0x30f4   :  { %v1927_v56 = vpop.f32.mrb[44].mxu0 }
0x30f5   :  { %v2954_v58 = vadd.f32 %v3775_v34, %v1927_v56  ;;  %v2884_v59 = vpop.f32.mrb[45].mxu0 }
0x30f6   :  { %v1930_v60 = vpop.f32.mrb[46].mxu0 }
0x30f7   :  { %v1937_v61 = vpack.c.bf16 %v2954_v58, %v2954_v58  ;;  %v2885_v24 = vpop.f32.mrb[47].mxu0  ;;  %v2584_v60 = vld [vmem:[%s3878_s7 + $0x5] ss:$0 sm:$0xff]  ;;  %s3210_s7 = smov [#allocation6]  }
0x30f8   :  { %s2520_s21 = sshll.u32 %s3210_s7, 4  ;;  %s2521_s21 = int_to_ptr.vmem [resolvable:$true] %s2520_s21 }
0x30f9   :  { %2891 = vmatmul.mubr.msk.bf16.vlgmr.msra.gmra.mrb[48].mxu1 %vm156_vm2, %v1937_v61  ;;  %s3151_s22 = scalar_lea.vmem %s2521_s21, 256  ;;  %p3156_p9 = scmp.lt.s32.totalorder %s2521_s21, %s2521_s21 }
0x30fa   :  { %2895 = vmatpush3.bf16.msra.mxu1 %v3628_v10  ;;  %2898 = vmatprep.mubr.msk.bf16.mxu1 %vm3205_vm0, %v3204_v0  ;;  %p3152_p8 = scmp.ne.s32.totalorder %s2521_s21, %s3151_s22  ;;  %p3157_p10 = scmp.lt.s32.totalorder %s3151_s22, %s3151_s22 }
0x30fb   :  { %2896 = vmatprep.subr.bf16.mxu1 %v3204_v0 }
0x30fc   :  { %v2111_v62 = vpop.f32.mrb[52].mxu0  ;;  %p3158_p11 = por %p3157_p10, %p3156_p9 }
0x30fd   :  { %v2112_v49 = vadd.f32 %v3652_v22, %v2111_v62  ;;  %v2908_v63 = vpop.f32.mrb[53].mxu0 }
0x30fe   :  { %2897 = vmatpush3.bf16.msra.mxu1 %v3635_v14  ;;  %v2114_v1 = vpop.f32.mrb[54].mxu0  ;;  %p3159_p12 = pnand %p3158_p11, %p3152_p8 }
0x30ff   :  { %v2115_v2 = vadd.f32 %v3652_v22, %v2114_v1  ;;  %v2909_v3 = vpop.f32.mrb[55].mxu0  ;;  %2910 = vmatprep.subr.bf16.mxu1 %v3204_v0 }
0x3101   :  { %2899 = vmatmul.mubr.msk.bf16.vlgmr.msra.gmra.mrb[52].mxu1 %vm156_vm2, %v2026_v4  ;;  %v2121_v10 = vpack.c.bf16 %v2115_v2, %v2112_v49 }
0x3102   :  { %2912 = vmatprep.mubr.msk.bf16.mxu1 %vm3205_vm0, %v3204_v0 }
0x3103   :  { %2186 = vrot.lane.b32.xlu0 %v2121_v10, %s3207_s2  ;;  %v2126_v5 = vsel %vm108_vm1, %v2121_v10, 0 }
0x3107   :  { %2285 = vrot.lane.b32.xlu0 %v2121_v10, %s3208_s0  ;;  %2911 = vmatpush3.bf16.xpose.msra.mxu1 %v2126_v5 }
0x3108   :  { %2922 = vmatprep.subr.bf16.mxu1 %v3204_v0 }
0x3175   :  { %v2187_v14 = vpop.permute.xlu0 %2186 }
0x3176   :  { %2919 = vmatmul.mubr.msk.bf16.vlgmr.msra.gmra.mrb[56].mxu0 %vm108_vm1, %v2187_v14 }
0x3177   :  { %2930 = vmatprep.mubr.msk.bf16.mxu0 %vm3205_vm0, %v3204_v0 }
0x3179   :  { %v2286_v22 = vpop.permute.xlu0 %2285 }
0x317a   :  { %v2291_v7 = vsel %vm108_vm1, %v2286_v22, 0 }
0x317b   :  { %2929 = vmatpush3.bf16.xpose.msra.mxu0 %v2291_v7 }
0x317c   :  { %2946 = vmatprep.subr.bf16.mxu0 %v3204_v0 }
0x31cc   :  { %v3799_v9 = vpop.f32.mrb[48].mxu1 }
0x31cd   :  { %v2892_v11 = vpop.f32.mrb[49].mxu1  ;;  %v1982_v24 = vadd.f32 %v2584_v60, %v3799_v9 }
0x31ce   :  { %v1984_v13 = vpop.f32.mrb[50].mxu1 }
0x31cf   :  { %v2893_v15 = vpop.f32.mrb[51].mxu1  ;;  %v1988_v63 = vsel %vm1987_vm11, %v1982_v24, -inf }
0x31d4   :  { %v2064_v16 = vpop.f32.mrb[52].mxu1 }
0x31d5   :  { %v2065_v17 = vadd.f32 %v3686_v38, %v2064_v16  ;;  %v2900_v19 = vpop.f32.mrb[53].mxu1 }
0x31d6   :  { %v2067_v21 = vpop.f32.mrb[54].mxu1 }
0x31d7   :  { %v2120_v20 = vpack.c.bf16 %v2065_v17, %v2065_v17  ;;  %v2901_v23 = vpop.f32.mrb[55].mxu1 }
0x31d9   :  { %2283 = vrot.lane.b32.xlu1 %v2120_v20, %s3208_s0  ;;  %2913 = vmatmul.mubr.msk.bf16.vlgmr.msra.gmra.mrb[56].mxu1 %vm108_vm1, %v2120_v20 }
0x31da   :  { %2924 = vmatprep.mubr.msk.bf16.mxu1 %vm3205_vm0, %v3204_v0 }
0x3249   :  { %v2225_v8 = vpop.f32.mrb[56].mxu0 }
0x324a   :  { %v2920_v25 = vpop.f32.mrb[57].mxu0 }
0x324b   :  { %v2284_v26 = vpop.permute.xlu1 %2283  ;;  %v2228_v27 = vpop.f32.mrb[58].mxu0 }
0x324c   :  { %2931 = vmatmul.mubr.msk.bf16.vlgmr.msra.gmra.mrb[60].mxu0 %vm108_vm1, %v2284_v26  ;;  %v2233_v12 = vpack.c.bf16 %v2228_v27, %v2225_v8  ;;  %v2921_v28 = vpop.f32.mrb[59].mxu0 }
0x324d   :  { %2947 = vmatpush3.bf16.msra.mxu0 %v3737_v37  ;;  %2950 = vmatprep.mubr.msk.bf16.mxu0 %vm3205_vm0, %v3204_v0 }
0x324e   :  { %v2238_v38 = vsel %vm1492_vm8, %v2233_v12, 0  ;;  %2948 = vmatprep.subr.bf16.mxu0 %v3204_v0 }
0x324f   :  { %2923 = vmatpush3.bf16.msra.mxu1 %v2238_v38 }
0x3250   :  { %2934 = vmatprep.subr.bf16.mxu1 %v3204_v0 }
0x3251   :  { %2949 = vmatpush3.bf16.msra.mxu0 %v3768_v6 }
0x32ac   :  { %v2162_v33 = vpop.f32.mrb[56].mxu1 }
0x32ad   :  { %v2168_v35 = vmul.f32 0.25, %v2162_v33  ;;  %v2914_v36 = vpop.f32.mrb[57].mxu1 }
0x32ae   :  { %v2165_v37 = vpop.f32.mrb[58].mxu1 }
0x32af   :  { %v2915_v39 = vpop.f32.mrb[59].mxu1  ;;  %v2173_v40 = vadd.f32 %v2172_v45, %v2168_v35 }
0x32b1   :  { %v2174_v41 = vsel %vm1666_vm10, %v2173_v40, -inf }
0x32b2   :  { %2175 = vmax.xlane.f32.xlu0 %v2174_v41 }
0x32c8   :  { %2346 = vrot.lane.b32.xlu0 %v2121_v10, %s3209_s1 }
0x331f   :  { %v2327_v42 = vpop.f32.mrb[60].mxu0 }
0x3320   :  { %v2932_v43 = vpop.f32.mrb[61].mxu0  ;;  %v2333_v54 = vmul.f32 0.25, %v2327_v42 }
0x3321   :  { %v2330_v53 = vpop.f32.mrb[62].mxu0 }
0x3322   :  { %v2933_v44 = vpop.f32.mrb[63].mxu0  ;;  %v2334_v50 = vadd.f32 %v2333_v54, %v2172_v45 }
0x3324   :  { %v2335_v51 = vsel %vm1666_vm10, %v2334_v50, -inf }
0x333f   :  { %v2176_v46 = vpop.xlane.xlu0 %2175 }
0x3340   :  { %v2177_v47 = vsub.f32 %v2173_v40, %v2176_v46 }
0x3342   :  { %v2178_v48 = vmul.f32 1.442695, %v2177_v47 }
0x3343   :  { %v2347_v49 = vpop.permute.xlu0 %2346 }
0x3344   :  { %3113 = vpow2.f32 %v2178_v48 }
0x334e   :  { %v3114_v57 = vpop.eup %3113 }
0x334f   :  { %v2180_v18 = vsel %vm1666_vm10, %v3114_v57, 0.0 }
0x3350   :  { %2181 = vadd.xlane.f32.xlu1 %v2180_v18 }
0x3354   :  { %2336 = vmax.xlane.f32.xlu1 %v2335_v51 }
0x33dd   :  { %v2182_v52 = vpop.xlane.xlu1 %2181 }
0x33de   :  { %3115 = vrcp.f32 %v2182_v52 }
0x33e1   :  { %v2337_v29 = vpop.xlane.xlu1 %2336 }
0x33e2   :  { %v2338_v55 = vsub.f32 %v2334_v50, %v2337_v29 }
0x33e4   :  { %v2339_v6 = vmul.f32 1.442695, %v2338_v55 }
0x33e6   :  { %3117 = vpow2.f32 %v2339_v6 }
0x33e8   :  { %v3116_v56 = vpop.eup %3115 }
0x33e9   :  { %v2184_v58 = vmul.f32 %v3116_v56, %v3114_v57 }
0x33eb   :  { %v2232_v59 = vpack.c.bf16 %v2184_v58, %v2184_v58 }
0x33ed   :  { %2925 = vmatmul.mubr.msk.bf16.vlgmr.msra.gmra.mrb[60].mxu1 %vm1666_vm10, %v2232_v59 }
0x33ee   :  { %2935 = vmatpush3.bf16.msra.mxu1 %v3721_v31  ;;  %2936 = vmatprep.mubr.msk.bf16.mxu1 %vm3205_vm0, %v3204_v0 }
0x33ef   :  { %2940 = vmatprep.subr.bf16.mxu1 %v3204_v0 }
0x33f0   :  { %v3118_v61 = vpop.eup %3117 }
0x33f1   :  { %v2341_v62 = vsel %vm1666_vm10, %v3118_v61, 0.0 }
0x33f2   :  { %2342 = vadd.xlane.f32.xlu1 %v2341_v62 }
0x33f5   :  { %2937 = vmatmul.mubr.msk.bf16.vlgmr.msra.gmra.mrb[64].mxu1 %vm108_vm1, %v2347_v49 }
0x33f6   :  { %1989 = vmax.xlane.f32.xlu1 %v1988_v63  ;;  %2942 = vmatprep.mubr.msk.bf16.mxu1 %vm3205_vm0, %v3204_v0 }
0x347f   :  { %v2343_v31 = vpop.xlane.xlu1 %2342 }
0x3480   :  { %3119 = vrcp.f32 %v2343_v31 }
0x3483   :  { %v1990_v21 = vpop.xlane.xlu1 %1989 }
0x3484   :  { %v1991_v20 = vsub.f32 %v1982_v24, %v1990_v21 }
0x3486   :  { %v1992_v23 = vmul.f32 1.442695, %v1991_v20 }
0x3488   :  { %3121 = vpow2.f32 %v1992_v23 }
0x348a   :  { %v3120_v1 = vpop.eup %3119 }
0x348b   :  { %v2345_v2 = vmul.f32 %v3120_v1, %v3118_v61 }
0x348d   :  { %v2441_v3 = vadd.f32 %v2345_v2, %v2184_v58  ;;  %v2392_v11 = vpack.c.bf16 %v2345_v2, %v2345_v2 }
0x348f   :  { %v2442_v4 = vmul.f32 0.5, %v2441_v3 }
0x3491   :  { %2444 = vst.msk [vmem:[#allocation6 + $0x8] sm:$0xff] %vm1666_vm10, %v2442_v4 }
0x3492   :  { %v3122_v38 = vpop.eup %3121 }
0x34c8   :  { %v2385_v10 = vpop.f32.mrb[64].mxu1 }
0x34c9   :  { %v2938_v5 = vpop.f32.mrb[65].mxu1 }
0x34ca   :  { %v2388_v14 = vpop.f32.mrb[66].mxu1 }
0x34cb   :  { %v2393_v22 = vpack.c.bf16 %v2388_v14, %v2385_v10  ;;  %v2939_v7 = vpop.f32.mrb[67].mxu1 }
0x34cd   :  { %v2398_v9 = vsel %vm1492_vm8, %v2393_v22, 0 }
0x34ce   :  { %2941 = vmatpush3.bf16.msra.mxu1 %v2398_v9 }
0x34d1   :  { %2943 = vmatmul.mubr.msk.bf16.vlgmr.msra.gmra.mrb[60].mxu1 %vm1666_vm10, %v2392_v11 }
0x35a4   :  { %v2434_v0 = vpop.f32.mrb[60].mxu1 }
0x35a5   :  { %v2955_v13 = vadd.f32 %v3775_v34, %v2434_v0  ;;  %v2944_v15 = vpop.f32.mrb[61].mxu1  ;;  %v1994_v34 = vsel %vm1987_vm11, %v3122_v38, 0.0 }
0x35a6   :  { %v2437_v16 = vpop.f32.mrb[62].mxu1 }
0x35a7   :  { %v2445_v17 = vpack.c.bf16 %v2955_v13, %v2955_v13  ;;  %v2945_v19 = vpop.f32.mrb[63].mxu1 }
0x35a9   :  { %2951 = vmatmul.mubr.msk.bf16.vlgmr.msra.gmra.mrb[64].mxu0 %vm156_vm2, %v2445_v17 }
0x367c   :  { %v2483_v8 = vpop.f32.mrb[64].mxu0 }
0x367d   :  { %v2484_v25 = vadd.f32 %v2584_v60, %v2483_v8  ;;  %v2952_v26 = vpop.f32.mrb[65].mxu0 }
0x367e   :  { %v2486_v27 = vpop.f32.mrb[66].mxu0 }
0x367f   :  { %v2953_v12 = vpop.f32.mrb[67].mxu0  ;;  %v2489_v28 = vsel %vm1987_vm11, %v2484_v25, -inf }
0x3680   :  { %2490 = vmax.xlane.f32.xlu1 %v2489_v28 }
0x3684   :  { %1995 = vadd.xlane.f32.xlu1 %v1994_v34 }
0x370d   :  { %v2491_v30 = vpop.xlane.xlu1 %2490 }
0x370e   :  { %v2492_v32 = vsub.f32 %v2484_v25, %v2491_v30 }
0x3710   :  { %v2493_v45 = vmul.f32 1.442695, %v2492_v32 }
0x3711   :  { %v1996_v33 = vpop.xlane.xlu1 %1995 }
0x3712   :  { %3123 = vpow2.f32 %v2493_v45 }
0x3713   :  { %3125 = vlog2.f32 %v1996_v33 }
0x371c   :  { %v3124_v35 = vpop.eup %3123 }
0x371d   :  { %v3126_v36 = vpop.eup %3125  ;;  %v2495_v37 = vsel %vm1987_vm11, %v3124_v35, 0.0 }
0x371e   :  { %v1998_v39 = vmul.f32 0.6931472, %v3126_v36  ;;  %2496 = vadd.xlane.f32.xlu0 %v2495_v37 }
0x3720   :  { %v1999_v40 = vsub.f32 %v1991_v20, %v1998_v39 }
0x3722   :  { %2000 = vst.msk [vmem:[#allocation5] sm:$0xff] %vm1987_vm11, %v1999_v40 }
0x3723   :  { %3162 = shalt.err (!%p3159_p12)
}
0x3724   :  { %s3163_s25 = scalar_lea.hbm %s3880_s9, 256 }
0x3725   :  { %p3164_p13 = scmp.ne.s32.totalorder %s3880_s9, %s3163_s25  ;;  %p3167_p0 = scmp.lt.u32.totalorder %s3163_s25, %s3880_s9 }
0x3727   :  { %p3169_p1 = pnand %p3167_p0, %p3164_p13 }
0x3729   :  { %3172 = shalt.err (!%p3169_p1)
}
0x372a   :  { %s3211_s29 = smov 128   ;;  %s3212_s19 = smov 8  }
0x372b   :  { %2526 = dma.vmem_to_hbm [thread:$0]  %s2521_s21, 256, %s3880_s9, [#allocation7], %s3211_s29, %s3211_s29, %s3212_s19  }
0x372c   :  { %s3213_s11 = smov [#allocation5]  }
0x372d   :  { %s2508_s12 = sshll.u32 %s3213_s11, 4  ;;  %s2509_s12 = int_to_ptr.vmem [resolvable:$true] %s2508_s12 }
0x372e   :  { %s3173_s5 = scalar_lea.vmem %s2509_s12, 256  ;;  %p3178_p3 = scmp.lt.s32.totalorder %s2509_s12, %s2509_s12 }
0x372f   :  { %p3174_p2 = scmp.ne.s32.totalorder %s2509_s12, %s3173_s5  ;;  %p3179_p4 = scmp.lt.s32.totalorder %s3173_s5, %s3173_s5 }
0x3731   :  { %p3180_p5 = por %p3179_p4, %p3178_p3 }
0x3733   :  { %p3181_p6 = pnand %p3180_p5, %p3174_p2 }
0x37ab   :  { %v2497_v41 = vpop.xlane.xlu0 %2496 }
0x37ac   :  { %3127 = vlog2.f32 %v2497_v41 }
0x37b6   :  { %v3128_v42 = vpop.eup %3127 }
0x37b7   :  { %v2499_v43 = vmul.f32 0.6931472, %v3128_v42 }
0x37b9   :  { %v2500_v53 = vsub.f32 %v2492_v32, %v2499_v43 }
0x37bb   :  { %2502 = vst.msk [vmem:[#allocation5 + $0x8] sm:$0xff] %vm1987_vm11, %v2500_v53 }
0x37bc   :  { %3184 = shalt.err (!%p3181_p6)
}
0x37bd   :  { %s3185_s9 = scalar_lea.hbm %s3879_s8, 256 }
0x37be   :  { %p3186_p7 = scmp.ne.s32.totalorder %s3879_s8, %s3185_s9  ;;  %p3189_p8 = scmp.lt.u32.totalorder %s3185_s9, %s3879_s8 }
0x37c0   :  { %p3191_p9 = pnand %p3189_p8, %p3186_p7 }
0x37c2   :  { %3194 = shalt.err (!%p3191_p9)
}
0x37c3   :  { %2514 = dma.vmem_to_hbm [thread:$0]  %s2509_s12, 256, %s3879_s8, [#allocation4], %s3211_s29, %s3211_s29, %s3212_s19  }
0x37c4   :  { %3197 = dma.done.wait [#allocation4], 256  }
0x37c5   :  { %3198 = vsyncadd [#allocation4], 4294967040 }
0x37c6   :  { %3199 = dma.done.wait [#allocation7], 256  }
0x37c7   :  { %3200 = vsyncadd [#allocation7], 4294967040 }
0x37c8   :  { %2533 = vsyncpa [#allocation3], 1 }
0x37c9   :  { %2534 = vsyncpa [#allocation4], 1 }
0x37ca   :  { %2535 = vsyncpa [#allocation7], 1 }

</bundles_post_ra>
